<compile_context>
chip_gen: v7x
topology: tpu7x:2x2x1
jax: 0.10.0
libtpu: 0.0.40
codegen_flags: <defaults>
</compile_context>

<pallas_src>
import functools

import jax
import jax.numpy as jnp
from jax.experimental import pallas as pl
from jax.experimental.pallas import tpu as pltpu


def _gelu_exact(x):
    # PyTorch nn.GELU() default = exact erf-based GELU (kept for exact parity;
    # tanh-approx GELU is only worth it if the VALU slot saturates at large H).
    return 0.5 * x * (1.0 + jax.lax.erf(x * 0.7071067811865476))


def _nonlinear_part_kernel(x_ref, w0_ref, b0_ref,
                           wr1_ref, br1_ref, wr2_ref, br2_ref,
                           wout_ref, bout_ref, o_ref, *, num_blocks):
    # x_ref: (bm, n) native-layout tile.  Fold the transpose into the MXU:
    # h^T = W0 @ x^T == dot_general(W0, x, contract W0[1] with x[1]) -> (H, bm)
    h = jax.lax.dot_general(
        w0_ref[...], x_ref[...],
        dimension_numbers=(((1,), (1,)), ((), ())),
        preferred_element_type=jnp.float32) + b0_ref[...]

    # Residual blocks: h = h + W2 @ GELU(W1 @ h + b1) + b2   (all (H, bm))
    for r in range(num_blocks):  # static unroll (num_blocks is a Python int)
        t = jnp.dot(wr1_ref[r], h, preferred_element_type=jnp.float32) + br1_ref[r]
        t = _gelu_exact(t)
        t = jnp.dot(wr2_ref[r], t, preferred_element_type=jnp.float32) + br2_ref[r]
        h = h + t

    # Output Linear (H -> 1): VPU multiply + sublane (XLU) reduce instead of an
    # M=1 MXU matmul (which would waste 127/255 MXU rows); result is a
    # lane-dense (1, bm) row -> unmasked vst.
    o = jnp.sum(h * wout_ref[...], axis=0, keepdims=True) + bout_ref[...]
    o_ref[...] = o.astype(o_ref.dtype)


def _auto_bm(B):
    """Batch tile: as large as possible (amortize per-step overhead, fill the
    256-wide MXU on v6e/v7x), but keep >=2 grid steps when the batch allows so
    ("parallel",) semantics can shard steps across v7x's two TensorCores."""
    B128 = pl.cdiv(B, 128) * 128
    if B128 <= 256:
        return B128                            # tiny batch: single step
    half = (B128 // 2) // 128 * 128            # largest 128-multiple <= B/2
    return max(128, min(512, half))


def _in_specs(n, H, R, bm, *, single_buffer_weights):
    # x changes every grid step -> default double-buffered pipelining.
    # Weights/biases are grid-invariant -> request single buffering.
    def const(shape):
        if single_buffer_weights:
            return pl.BlockSpec(shape, lambda i: (0,) * len(shape),
                                pipeline_mode=pl.Buffered(1))
        return pl.BlockSpec(shape, lambda i: (0,) * len(shape))

    return [
        pl.BlockSpec((bm, n), lambda i: (i, 0)),   # x tile, native (B, n) layout
        const((H, n)),        # w0   (out, in)
        const((H, 1)),        # b0
        const((R, H, H)),     # wr1  (stacked over residual blocks)
        const((R, H, 1)),     # br1
        const((R, H, H)),     # wr2
        const((R, H, 1)),     # br2
        const((H, 1)),        # wout (= torch W.T)
        const((1, 1)),        # bout
    ]


def nonlinear_part_forward(x, params, *, num_residual_blocks, bm=None):
    """x: (B, n) float32 (native layout).  params in PyTorch (out, in) weight
    layout (see init_params).  Returns (B, 1)."""
    B, n = x.shape
    H = params["w0"].shape[0]
    R = num_residual_blocks

    if bm is None:
        bm = _auto_bm(B)
    B_pad = pl.cdiv(B, bm) * bm
    x_p = x if B_pad == B else jnp.pad(x, ((0, B_pad - B), (0, 0)))  # tail only
    grid = (B_pad // bm,)

    kernel = functools.partial(_nonlinear_part_kernel, num_blocks=R)

    flops = 2 * B_pad * (n * H + 2 * R * H * H + H)
    bytes_accessed = 4 * (B_pad * n + B_pad                     # x, out
                          + H * n + H                           # w0, b0
                          + 2 * R * H * H + 2 * R * H           # residual W, b
                          + H + 1)                              # wout, bout

    operands = (x_p, params["w0"], params["b0"],
                params["wr1"], params["br1"], params["wr2"], params["br2"],
                params["wout"], params["bout"])

    def call(single_buffer_weights):
        return pl.pallas_call(
            kernel,
            out_shape=jax.ShapeDtypeStruct((1, B_pad), x.dtype),
            grid_spec=pltpu.PrefetchScalarGridSpec(
                num_scalar_prefetch=0,
                grid=grid,
                in_specs=_in_specs(n, H, R, bm,
                                   single_buffer_weights=single_buffer_weights),
                out_specs=pl.BlockSpec((1, bm), lambda i: (0, i)),  # lane-dense
            ),
            compiler_params=pltpu.CompilerParams(
                dimension_semantics=("parallel",),   # shard steps across TCs (v7x)
                vmem_limit_bytes=32 << 20),
            cost_estimate=pl.CostEstimate(
                flops=flops,
                transcendentals=0,   # erf lowers to a VPU polynomial, not EUP
                bytes_accessed=bytes_accessed),
        )(*operands)

    # NOTE: for large H/R on v7x (64 MiB VMEM) the stacked (R,H,H) residual
    # weights should instead be streamed over an extra "arbitrary" r grid axis
    # with h carried in VMEM scratch; not needed at H=32, R=2.
    try:
        out_t = call(True)
    except Exception:
        # pl.Buffered(1) single-buffering not supported by this jax build ->
        # fall back to default double-buffered weight specs (2x weight VMEM,
        # still tiny at H=32).
        out_t = call(False)

    return out_t[:, :B].T  # (B, 1)


def init_params(key, n, num_residual_blocks, p=2, lb=True):
    """Deterministic synthetic parameters matching nonlinear_part.__init__ shapes.

    Weights are stored in native PyTorch layout (out_features, in_features),
    biases as column vectors, except wout which is stored as (H, 1) = torch W.T.
    """
    H = n * p
    R = num_residual_blocks
    keys = jax.random.split(key, 8)
    scale0 = 1.0 / jnp.sqrt(n)
    scaleH = 1.0 / jnp.sqrt(H)
    params = {
        "w0":   jax.random.normal(keys[0], (H, n), jnp.float32) * scale0,
        "b0":   jax.random.normal(keys[1], (H, 1), jnp.float32) * scale0,
        "wr1":  jax.random.normal(keys[2], (R, H, H), jnp.float32) * scaleH,
        "br1":  jax.random.normal(keys[3], (R, H, 1), jnp.float32) * scaleH,
        "wr2":  jax.random.normal(keys[4], (R, H, H), jnp.float32) * scaleH,
        "br2":  jax.random.normal(keys[5], (R, H, 1), jnp.float32) * scaleH,
        "wout": jax.random.normal(keys[6], (H, 1), jnp.float32) * scaleH,
        "bout": (jax.random.normal(keys[7], (1, 1), jnp.float32) * scaleH
                 if lb else jnp.zeros((1, 1), jnp.float32)),
    }
    return params


def reference_forward(x, params, *, num_residual_blocks):
    """Pure-JAX reference in the standard (batch, features) layout."""
    h = x @ params["w0"].T + params["b0"].T
    for r in range(num_residual_blocks):
        t = h @ params["wr1"][r].T + params["br1"][r].T
        t = _gelu_exact(t)
        t = t @ params["wr2"][r].T + params["br2"][r].T
        h = h + t
    return h @ params["wout"] + params["bout"]


if __name__ == "__main__":
    # nonlinear_part(n=16, num_residual_blocks=2, p=2, lb=True)
    n, R, p = 16, 2, 2
    B = 512   # auto tiling -> bm=256, grid=(2,): 2x larger lane-dense tiles than
              # before, and two steps so v7x megacore sharding still applies.

    key = jax.random.PRNGKey(0)
    kx, kp = jax.random.split(key)
    x = jax.random.normal(kx, (B, n), jnp.float32)
    params = init_params(kp, n, R, p=p, lb=True)

    out = nonlinear_part_forward(x, params, num_residual_blocks=R)
    out = jax.block_until_ready(out)

    ref = reference_forward(x, params, num_residual_blocks=R)
    assert out.shape == (B, 1)
    assert jnp.allclose(out, ref, atol=1e-4, rtol=1e-4)

    print("KERNEL_OK")
</pallas_src>

<mosaic_0001>
module attributes {stable_mosaic.version = 11 : i64} {
  func.func @_nonlinear_part_kernel(%arg0: i32, %arg1: memref<256x16xf32, #tpu.memory_space<vmem>>, %arg2: memref<32x16xf32, #tpu.memory_space<vmem>>, %arg3: memref<32x1xf32, #tpu.memory_space<vmem>>, %arg4: memref<2x32x32xf32, #tpu.memory_space<vmem>>, %arg5: memref<2x32x1xf32, #tpu.memory_space<vmem>>, %arg6: memref<2x32x32xf32, #tpu.memory_space<vmem>>, %arg7: memref<2x32x1xf32, #tpu.memory_space<vmem>>, %arg8: memref<32x1xf32, #tpu.memory_space<vmem>>, %arg9: memref<1x1xf32, #tpu.memory_space<vmem>>, %arg10: memref<1x256xf32, #tpu.memory_space<vmem>>) attributes {dimension_semantics = [#tpu.dimension_semantics<parallel>], iteration_bounds = array<i64: 2>, scalar_prefetch = 0 : i64, scratch_operands = 0 : i64, tpu.core_type = #tpu.core_type<tc>, window_params = [{transform_indices = @transform_0, window_bounds = array<i64: 256, 16>}, {pipeline_mode = #tpu.pipeline_mode<synchronous>, transform_indices = @transform_1, window_bounds = array<i64: 32, 16>}, {pipeline_mode = #tpu.pipeline_mode<synchronous>, transform_indices = @transform_2, window_bounds = array<i64: 32, 1>}, {pipeline_mode = #tpu.pipeline_mode<synchronous>, transform_indices = @transform_3, window_bounds = array<i64: 2, 32, 32>}, {pipeline_mode = #tpu.pipeline_mode<synchronous>, transform_indices = @transform_4, window_bounds = array<i64: 2, 32, 1>}, {pipeline_mode = #tpu.pipeline_mode<synchronous>, transform_indices = @transform_5, window_bounds = array<i64: 2, 32, 32>}, {pipeline_mode = #tpu.pipeline_mode<synchronous>, transform_indices = @transform_6, window_bounds = array<i64: 2, 32, 1>}, {pipeline_mode = #tpu.pipeline_mode<synchronous>, transform_indices = @transform_7, window_bounds = array<i64: 32, 1>}, {pipeline_mode = #tpu.pipeline_mode<synchronous>, transform_indices = @transform_8, window_bounds = array<i64: 1, 1>}, {transform_indices = @transform_9, window_bounds = array<i64: 1, 256>}]} {
    %c0 = arith.constant 0 : index
    %c0_0 = arith.constant 0 : index
    %0 = vector.load %arg2[%c0, %c0_0] : memref<32x16xf32, #tpu.memory_space<vmem>>, vector<32x16xf32>
    %c0_1 = arith.constant 0 : index
    %c0_2 = arith.constant 0 : index
    %1 = vector.load %arg1[%c0_1, %c0_2] : memref<256x16xf32, #tpu.memory_space<vmem>>, vector<256x16xf32>
    %cst = arith.constant dense<0.000000e+00> : vector<32x256xf32>
    %2 = tpu.matmul %0, %1, %cst {dimension_numbers = #tpu.dot_dimension_numbers<[1], [1], [0], [0], [0, 0, 1, 0], [], []>} : vector<32x16xf32>, vector<256x16xf32>, vector<32x256xf32> -> vector<32x256xf32>
    %c0_3 = arith.constant 0 : index
    %c0_4 = arith.constant 0 : index
    %3 = vector.load %arg3[%c0_3, %c0_4] : memref<32x1xf32, #tpu.memory_space<vmem>>, vector<32x1xf32>
    %4 = vector.broadcast %3 : vector<32x1xf32> to vector<32x256xf32>
    %5 = arith.addf %2, %4 : vector<32x256xf32>
    %c0_5 = arith.constant 0 : index
    %c0_6 = arith.constant 0 : index
    %c0_7 = arith.constant 0 : index
    %6 = vector.load %arg4[%c0_5, %c0_6, %c0_7] : memref<2x32x32xf32, #tpu.memory_space<vmem>>, vector<1x32x32xf32>
    %7 = vector.shape_cast %6 : vector<1x32x32xf32> to vector<32x32xf32>
    %cst_8 = arith.constant dense<0.000000e+00> : vector<32x256xf32>
    %8 = tpu.matmul %7, %5, %cst_8 {dimension_numbers = #tpu.dot_dimension_numbers<[1], [0], [0], [1], [0, 0, 1, 1], [], []>} : vector<32x32xf32>, vector<32x256xf32>, vector<32x256xf32> -> vector<32x256xf32>
    %c0_9 = arith.constant 0 : index
    %c0_10 = arith.constant 0 : index
    %c0_11 = arith.constant 0 : index
    %9 = vector.load %arg5[%c0_9, %c0_10, %c0_11] : memref<2x32x1xf32, #tpu.memory_space<vmem>>, vector<1x32x1xf32>
    %10 = vector.shape_cast %9 : vector<1x32x1xf32> to vector<32x1xf32>
    %11 = vector.broadcast %10 : vector<32x1xf32> to vector<32x256xf32>
    %12 = arith.addf %8, %11 : vector<32x256xf32>
    %cst_12 = arith.constant 5.000000e-01 : f32
    %13 = vector.broadcast %cst_12 : f32 to vector<32x256xf32>
    %14 = arith.mulf %13, %12 : vector<32x256xf32>
    %cst_13 = arith.constant 0.707106769 : f32
    %15 = vector.broadcast %cst_13 : f32 to vector<32x256xf32>
    %16 = arith.mulf %12, %15 : vector<32x256xf32>
    %17 = math.erf %16 : vector<32x256xf32>
    %cst_14 = arith.constant 1.000000e+00 : f32
    %18 = vector.broadcast %cst_14 : f32 to vector<32x256xf32>
    %19 = arith.addf %18, %17 : vector<32x256xf32>
    %20 = arith.mulf %14, %19 : vector<32x256xf32>
    %c0_15 = arith.constant 0 : index
    %c0_16 = arith.constant 0 : index
    %c0_17 = arith.constant 0 : index
    %21 = vector.load %arg6[%c0_15, %c0_16, %c0_17] : memref<2x32x32xf32, #tpu.memory_space<vmem>>, vector<1x32x32xf32>
    %22 = vector.shape_cast %21 : vector<1x32x32xf32> to vector<32x32xf32>
    %cst_18 = arith.constant dense<0.000000e+00> : vector<32x256xf32>
    %23 = tpu.matmul %22, %20, %cst_18 {dimension_numbers = #tpu.dot_dimension_numbers<[1], [0], [0], [1], [0, 0, 1, 1], [], []>} : vector<32x32xf32>, vector<32x256xf32>, vector<32x256xf32> -> vector<32x256xf32>
    %c0_19 = arith.constant 0 : index
    %c0_20 = arith.constant 0 : index
    %c0_21 = arith.constant 0 : index
    %24 = vector.load %arg7[%c0_19, %c0_20, %c0_21] : memref<2x32x1xf32, #tpu.memory_space<vmem>>, vector<1x32x1xf32>
    %25 = vector.shape_cast %24 : vector<1x32x1xf32> to vector<32x1xf32>
    %26 = vector.broadcast %25 : vector<32x1xf32> to vector<32x256xf32>
    %27 = arith.addf %23, %26 : vector<32x256xf32>
    %28 = arith.addf %5, %27 : vector<32x256xf32>
    %c1 = arith.constant 1 : index
    %c0_22 = arith.constant 0 : index
    %c0_23 = arith.constant 0 : index
    %29 = vector.load %arg4[%c1, %c0_22, %c0_23] : memref<2x32x32xf32, #tpu.memory_space<vmem>>, vector<1x32x32xf32>
    %30 = vector.shape_cast %29 : vector<1x32x32xf32> to vector<32x32xf32>
    %cst_24 = arith.constant dense<0.000000e+00> : vector<32x256xf32>
    %31 = tpu.matmul %30, %28, %cst_24 {dimension_numbers = #tpu.dot_dimension_numbers<[1], [0], [0], [1], [0, 0, 1, 1], [], []>} : vector<32x32xf32>, vector<32x256xf32>, vector<32x256xf32> -> vector<32x256xf32>
    %c1_25 = arith.constant 1 : index
    %c0_26 = arith.constant 0 : index
    %c0_27 = arith.constant 0 : index
    %32 = vector.load %arg5[%c1_25, %c0_26, %c0_27] : memref<2x32x1xf32, #tpu.memory_space<vmem>>, vector<1x32x1xf32>
    %33 = vector.shape_cast %32 : vector<1x32x1xf32> to vector<32x1xf32>
    %34 = vector.broadcast %33 : vector<32x1xf32> to vector<32x256xf32>
    %35 = arith.addf %31, %34 : vector<32x256xf32>
    %cst_28 = arith.constant 5.000000e-01 : f32
    %36 = vector.broadcast %cst_28 : f32 to vector<32x256xf32>
    %37 = arith.mulf %36, %35 : vector<32x256xf32>
    %cst_29 = arith.constant 0.707106769 : f32
    %38 = vector.broadcast %cst_29 : f32 to vector<32x256xf32>
    %39 = arith.mulf %35, %38 : vector<32x256xf32>
    %40 = math.erf %39 : vector<32x256xf32>
    %cst_30 = arith.constant 1.000000e+00 : f32
    %41 = vector.broadcast %cst_30 : f32 to vector<32x256xf32>
    %42 = arith.addf %41, %40 : vector<32x256xf32>
    %43 = arith.mulf %37, %42 : vector<32x256xf32>
    %c1_31 = arith.constant 1 : index
    %c0_32 = arith.constant 0 : index
    %c0_33 = arith.constant 0 : index
    %44 = vector.load %arg6[%c1_31, %c0_32, %c0_33] : memref<2x32x32xf32, #tpu.memory_space<vmem>>, vector<1x32x32xf32>
    %45 = vector.shape_cast %44 : vector<1x32x32xf32> to vector<32x32xf32>
    %cst_34 = arith.constant dense<0.000000e+00> : vector<32x256xf32>
    %46 = tpu.matmul %45, %43, %cst_34 {dimension_numbers = #tpu.dot_dimension_numbers<[1], [0], [0], [1], [0, 0, 1, 1], [], []>} : vector<32x32xf32>, vector<32x256xf32>, vector<32x256xf32> -> vector<32x256xf32>
    %c1_35 = arith.constant 1 : index
    %c0_36 = arith.constant 0 : index
    %c0_37 = arith.constant 0 : index
    %47 = vector.load %arg7[%c1_35, %c0_36, %c0_37] : memref<2x32x1xf32, #tpu.memory_space<vmem>>, vector<1x32x1xf32>
    %48 = vector.shape_cast %47 : vector<1x32x1xf32> to vector<32x1xf32>
    %49 = vector.broadcast %48 : vector<32x1xf32> to vector<32x256xf32>
    %50 = arith.addf %46, %49 : vector<32x256xf32>
    %51 = arith.addf %28, %50 : vector<32x256xf32>
    %c0_38 = arith.constant 0 : index
    %c0_39 = arith.constant 0 : index
    %52 = vector.load %arg8[%c0_38, %c0_39] : memref<32x1xf32, #tpu.memory_space<vmem>>, vector<32x1xf32>
    %53 = vector.broadcast %52 : vector<32x1xf32> to vector<32x256xf32>
    %54 = arith.mulf %51, %53 : vector<32x256xf32>
    %cst_40 = arith.constant dense<0.000000e+00> : vector<256xf32>
    %55 = vector.multi_reduction <add>, %54, %cst_40 [0] : vector<32x256xf32> to vector<256xf32>
    %56 = vector.shape_cast %55 : vector<256xf32> to vector<1x256xf32>
    %c0_41 = arith.constant 0 : index
    %c0_42 = arith.constant 0 : index
    %57 = vector.load %arg9[%c0_41, %c0_42] : memref<1x1xf32, #tpu.memory_space<vmem>>, vector<1x1xf32>
    %58 = vector.broadcast %57 : vector<1x1xf32> to vector<1x256xf32>
    %59 = arith.addf %56, %58 : vector<1x256xf32>
    %c0_43 = arith.constant 0 : index
    %c0_44 = arith.constant 0 : index
    %60 = vector.load %arg10[%c0_43, %c0_44] : memref<1x256xf32, #tpu.memory_space<vmem>>, vector<1x256xf32>
    tpu.vector_store %arg10[%c0_43, %c0_44], %59 {strides = array<i32>} : memref<1x256xf32, #tpu.memory_space<vmem>>, vector<1x256xf32>,
    return
  }
  func.func @transform_0(%arg0: i32) -> (i32, i32) {
    %c0_i32 = arith.constant 0 : i32
    %c0_i32_0 = arith.constant 0 : i32
    return %arg0, %c0_i32 : i32, i32
  }
  func.func @transform_1(%arg0: i32) -> (i32, i32) {
    %c0_i32 = arith.constant 0 : i32
    %c0_i32_0 = arith.constant 0 : i32
    %c0_i32_1 = arith.constant 0 : i32
    return %c0_i32, %c0_i32_0 : i32, i32
  }
  func.func @transform_2(%arg0: i32) -> (i32, i32) {
    %c0_i32 = arith.constant 0 : i32
    %c0_i32_0 = arith.constant 0 : i32
    %c0_i32_1 = arith.constant 0 : i32
    return %c0_i32, %c0_i32_0 : i32, i32
  }
  func.func @transform_3(%arg0: i32) -> (i32, i32, i32) {
    %c0_i32 = arith.constant 0 : i32
    %c0_i32_0 = arith.constant 0 : i32
    %c0_i32_1 = arith.constant 0 : i32
    %c0_i32_2 = arith.constant 0 : i32
    return %c0_i32, %c0_i32_0, %c0_i32_1 : i32, i32, i32
  }
  func.func @transform_4(%arg0: i32) -> (i32, i32, i32) {
    %c0_i32 = arith.constant 0 : i32
    %c0_i32_0 = arith.constant 0 : i32
    %c0_i32_1 = arith.constant 0 : i32
    %c0_i32_2 = arith.constant 0 : i32
    return %c0_i32, %c0_i32_0, %c0_i32_1 : i32, i32, i32
  }
  func.func @transform_5(%arg0: i32) -> (i32, i32, i32) {
    %c0_i32 = arith.constant 0 : i32
    %c0_i32_0 = arith.constant 0 : i32
    %c0_i32_1 = arith.constant 0 : i32
    %c0_i32_2 = arith.constant 0 : i32
    return %c0_i32, %c0_i32_0, %c0_i32_1 : i32, i32, i32
  }
  func.func @transform_6(%arg0: i32) -> (i32, i32, i32) {
    %c0_i32 = arith.constant 0 : i32
    %c0_i32_0 = arith.constant 0 : i32
    %c0_i32_1 = arith.constant 0 : i32
    %c0_i32_2 = arith.constant 0 : i32
    return %c0_i32, %c0_i32_0, %c0_i32_1 : i32, i32, i32
  }
  func.func @transform_7(%arg0: i32) -> (i32, i32) {
    %c0_i32 = arith.constant 0 : i32
    %c0_i32_0 = arith.constant 0 : i32
    %c0_i32_1 = arith.constant 0 : i32
    return %c0_i32, %c0_i32_0 : i32, i32
  }
  func.func @transform_8(%arg0: i32) -> (i32, i32) {
    %c0_i32 = arith.constant 0 : i32
    %c0_i32_0 = arith.constant 0 : i32
    %c0_i32_1 = arith.constant 0 : i32
    return %c0_i32, %c0_i32_0 : i32, i32
  }
  func.func @transform_9(%arg0: i32) -> (i32, i32) {
    %c0_i32 = arith.constant 0 : i32
    %c0_i32_0 = arith.constant 0 : i32
    return %c0_i32, %arg0 : i32, i32
  }
}

module attributes {stable_mosaic.version = 11 : i64} {
  func.func @_nonlinear_part_kernel(%arg0: i32, %arg1: memref<256x16xf32, #tpu.memory_space<vmem>>, %arg2: memref<32x16xf32, #tpu.memory_space<vmem>>, %arg3: memref<32x1xf32, #tpu.memory_space<vmem>>, %arg4: memref<2x32x32xf32, #tpu.memory_space<vmem>>, %arg5: memref<2x32x1xf32, #tpu.memory_space<vmem>>, %arg6: memref<2x32x32xf32, #tpu.memory_space<vmem>>, %arg7: memref<2x32x1xf32, #tpu.memory_space<vmem>>, %arg8: memref<32x1xf32, #tpu.memory_space<vmem>>, %arg9: memref<1x1xf32, #tpu.memory_space<vmem>>, %arg10: memref<1x256xf32, #tpu.memory_space<vmem>>) attributes {dimension_semantics = [#tpu.dimension_semantics<parallel>], iteration_bounds = array<i64: 2>, scalar_prefetch = 0 : i64, scratch_operands = 0 : i64, tpu.core_type = #tpu.core_type<tc>, window_params = [{transform_indices = @transform_0, window_bounds = array<i64: 256, 16>}, {pipeline_mode = #tpu.pipeline_mode<synchronous>, transform_indices = @transform_1, window_bounds = array<i64: 32, 16>}, {pipeline_mode = #tpu.pipeline_mode<synchronous>, transform_indices = @transform_2, window_bounds = array<i64: 32, 1>}, {pipeline_mode = #tpu.pipeline_mode<synchronous>, transform_indices = @transform_3, window_bounds = array<i64: 2, 32, 32>}, {pipeline_mode = #tpu.pipeline_mode<synchronous>, transform_indices = @transform_4, window_bounds = array<i64: 2, 32, 1>}, {pipeline_mode = #tpu.pipeline_mode<synchronous>, transform_indices = @transform_5, window_bounds = array<i64: 2, 32, 32>}, {pipeline_mode = #tpu.pipeline_mode<synchronous>, transform_indices = @transform_6, window_bounds = array<i64: 2, 32, 1>}, {pipeline_mode = #tpu.pipeline_mode<synchronous>, transform_indices = @transform_7, window_bounds = array<i64: 32, 1>}, {pipeline_mode = #tpu.pipeline_mode<synchronous>, transform_indices = @transform_8, window_bounds = array<i64: 1, 1>}, {transform_indices = @transform_9, window_bounds = array<i64: 1, 256>}]} {
    %c0 = arith.constant 0 : index
    %c0_0 = arith.constant 0 : index
    %0 = vector.load %arg2[%c0, %c0_0] : memref<32x16xf32, #tpu.memory_space<vmem>>, vector<32x16xf32>
    %c0_1 = arith.constant 0 : index
    %c0_2 = arith.constant 0 : index
    %1 = vector.load %arg1[%c0_1, %c0_2] : memref<256x16xf32, #tpu.memory_space<vmem>>, vector<256x16xf32>
    %cst = arith.constant dense<0.000000e+00> : vector<32x256xf32>
    %2 = tpu.matmul %0, %1, %cst {dimension_numbers = #tpu.dot_dimension_numbers<[1], [1], [0], [0], [0, 0, 1, 0], [], []>} : vector<32x16xf32>, vector<256x16xf32>, vector<32x256xf32> -> vector<32x256xf32>
    %c0_3 = arith.constant 0 : index
    %c0_4 = arith.constant 0 : index
    %3 = vector.load %arg3[%c0_3, %c0_4] : memref<32x1xf32, #tpu.memory_space<vmem>>, vector<32x1xf32>
    %4 = vector.broadcast %3 : vector<32x1xf32> to vector<32x256xf32>
    %5 = arith.addf %2, %4 : vector<32x256xf32>
    %c0_5 = arith.constant 0 : index
    %c0_6 = arith.constant 0 : index
    %c0_7 = arith.constant 0 : index
    %6 = vector.load %arg4[%c0_5, %c0_6, %c0_7] : memref<2x32x32xf32, #tpu.memory_space<vmem>>, vector<1x32x32xf32>
    %7 = vector.shape_cast %6 : vector<1x32x32xf32> to vector<32x32xf32>
    %cst_8 = arith.constant dense<0.000000e+00> : vector<32x256xf32>
    %8 = tpu.matmul %7, %5, %cst_8 {dimension_numbers = #tpu.dot_dimension_numbers<[1], [0], [0], [1], [0, 0, 1, 1], [], []>} : vector<32x32xf32>, vector<32x256xf32>, vector<32x256xf32> -> vector<32x256xf32>
    %c0_9 = arith.constant 0 : index
    %c0_10 = arith.constant 0 : index
    %c0_11 = arith.constant 0 : index
    %9 = vector.load %arg5[%c0_9, %c0_10, %c0_11] : memref<2x32x1xf32, #tpu.memory_space<vmem>>, vector<1x32x1xf32>
    %10 = vector.shape_cast %9 : vector<1x32x1xf32> to vector<32x1xf32>
    %11 = vector.broadcast %10 : vector<32x1xf32> to vector<32x256xf32>
    %12 = arith.addf %8, %11 : vector<32x256xf32>
    %cst_12 = arith.constant 5.000000e-01 : f32
    %13 = vector.broadcast %cst_12 : f32 to vector<32x256xf32>
    %14 = arith.mulf %13, %12 : vector<32x256xf32>
    %cst_13 = arith.constant 0.707106769 : f32
    %15 = vector.broadcast %cst_13 : f32 to vector<32x256xf32>
    %16 = arith.mulf %12, %15 : vector<32x256xf32>
    %17 = math.erf %16 : vector<32x256xf32>
    %cst_14 = arith.constant 1.000000e+00 : f32
    %18 = vector.broadcast %cst_14 : f32 to vector<32x256xf32>
    %19 = arith.addf %18, %17 : vector<32x256xf32>
    %20 = arith.mulf %14, %19 : vector<32x256xf32>
    %c0_15 = arith.constant 0 : index
    %c0_16 = arith.constant 0 : index
    %c0_17 = arith.constant 0 : index
    %21 = vector.load %arg6[%c0_15, %c0_16, %c0_17] : memref<2x32x32xf32, #tpu.memory_space<vmem>>, vector<1x32x32xf32>
    %22 = vector.shape_cast %21 : vector<1x32x32xf32> to vector<32x32xf32>
    %cst_18 = arith.constant dense<0.000000e+00> : vector<32x256xf32>
    %23 = tpu.matmul %22, %20, %cst_18 {dimension_numbers = #tpu.dot_dimension_numbers<[1], [0], [0], [1], [0, 0, 1, 1], [], []>} : vector<32x32xf32>, vector<32x256xf32>, vector<32x256xf32> -> vector<32x256xf32>
    %c0_19 = arith.constant 0 : index
    %c0_20 = arith.constant 0 : index
    %c0_21 = arith.constant 0 : index
    %24 = vector.load %arg7[%c0_19, %c0_20, %c0_21] : memref<2x32x1xf32, #tpu.memory_space<vmem>>, vector<1x32x1xf32>
    %25 = vector.shape_cast %24 : vector<1x32x1xf32> to vector<32x1xf32>
    %26 = vector.broadcast %25 : vector<32x1xf32> to vector<32x256xf32>
    %27 = arith.addf %23, %26 : vector<32x256xf32>
    %28 = arith.addf %5, %27 : vector<32x256xf32>
    %c1 = arith.constant 1 : index
    %c0_22 = arith.constant 0 : index
    %c0_23 = arith.constant 0 : index
    %29 = vector.load %arg4[%c1, %c0_22, %c0_23] : memref<2x32x32xf32, #tpu.memory_space<vmem>>, vector<1x32x32xf32>
    %30 = vector.shape_cast %29 : vector<1x32x32xf32> to vector<32x32xf32>
    %cst_24 = arith.constant dense<0.000000e+00> : vector<32x256xf32>
    %31 = tpu.matmul %30, %28, %cst_24 {dimension_numbers = #tpu.dot_dimension_numbers<[1], [0], [0], [1], [0, 0, 1, 1], [], []>} : vector<32x32xf32>, vector<32x256xf32>, vector<32x256xf32> -> vector<32x256xf32>
    %c1_25 = arith.constant 1 : index
    %c0_26 = arith.constant 0 : index
    %c0_27 = arith.constant 0 : index
    %32 = vector.load %arg5[%c1_25, %c0_26, %c0_27] : memref<2x32x1xf32, #tpu.memory_space<vmem>>, vector<1x32x1xf32>
    %33 = vector.shape_cast %32 : vector<1x32x1xf32> to vector<32x1xf32>
    %34 = vector.broadcast %33 : vector<32x1xf32> to vector<32x256xf32>
    %35 = arith.addf %31, %34 : vector<32x256xf32>
    %cst_28 = arith.constant 5.000000e-01 : f32
    %36 = vector.broadcast %cst_28 : f32 to vector<32x256xf32>
    %37 = arith.mulf %36, %35 : vector<32x256xf32>
    %cst_29 = arith.constant 0.707106769 : f32
    %38 = vector.broadcast %cst_29 : f32 to vector<32x256xf32>
    %39 = arith.mulf %35, %38 : vector<32x256xf32>
    %40 = math.erf %39 : vector<32x256xf32>
    %cst_30 = arith.constant 1.000000e+00 : f32
    %41 = vector.broadcast %cst_30 : f32 to vector<32x256xf32>
    %42 = arith.addf %41, %40 : vector<32x256xf32>
    %43 = arith.mulf %37, %42 : vector<32x256xf32>
    %c1_31 = arith.constant 1 : index
    %c0_32 = arith.constant 0 : index
    %c0_33 = arith.constant 0 : index
    %44 = vector.load %arg6[%c1_31, %c0_32, %c0_33] : memref<2x32x32xf32, #tpu.memory_space<vmem>>, vector<1x32x32xf32>
    %45 = vector.shape_cast %44 : vector<1x32x32xf32> to vector<32x32xf32>
    %cst_34 = arith.constant dense<0.000000e+00> : vector<32x256xf32>
    %46 = tpu.matmul %45, %43, %cst_34 {dimension_numbers = #tpu.dot_dimension_numbers<[1], [0], [0], [1], [0, 0, 1, 1], [], []>} : vector<32x32xf32>, vector<32x256xf32>, vector<32x256xf32> -> vector<32x256xf32>
    %c1_35 = arith.constant 1 : index
    %c0_36 = arith.constant 0 : index
    %c0_37 = arith.constant 0 : index
    %47 = vector.load %arg7[%c1_35, %c0_36, %c0_37] : memref<2x32x1xf32, #tpu.memory_space<vmem>>, vector<1x32x1xf32>
    %48 = vector.shape_cast %47 : vector<1x32x1xf32> to vector<32x1xf32>
    %49 = vector.broadcast %48 : vector<32x1xf32> to vector<32x256xf32>
    %50 = arith.addf %46, %49 : vector<32x256xf32>
    %51 = arith.addf %28, %50 : vector<32x256xf32>
    %c0_38 = arith.constant 0 : index
    %c0_39 = arith.constant 0 : index
    %52 = vector.load %arg8[%c0_38, %c0_39] : memref<32x1xf32, #tpu.memory_space<vmem>>, vector<32x1xf32>
    %53 = vector.broadcast %52 : vector<32x1xf32> to vector<32x256xf32>
    %54 = arith.mulf %51, %53 : vector<32x256xf32>
    %cst_40 = arith.constant dense<0.000000e+00> : vector<256xf32>
    %55 = vector.multi_reduction <add>, %54, %cst_40 [0] : vector<32x256xf32> to vector<256xf32>
    %56 = vector.shape_cast %55 : vector<256xf32> to vector<1x256xf32>
    %c0_41 = arith.constant 0 : index
    %c0_42 = arith.constant 0 : index
    %57 = vector.load %arg9[%c0_41, %c0_42] : memref<1x1xf32, #tpu.memory_space<vmem>>, vector<1x1xf32>
    %58 = vector.broadcast %57 : vector<1x1xf32> to vector<1x256xf32>
    %59 = arith.addf %56, %58 : vector<1x256xf32>
    %c0_43 = arith.constant 0 : index
    %c0_44 = arith.constant 0 : index
    %60 = vector.load %arg10[%c0_43, %c0_44] : memref<1x256xf32, #tpu.memory_space<vmem>>, vector<1x256xf32>
    tpu.vector_store %arg10[%c0_43, %c0_44], %59 {strides = array<i32>} : memref<1x256xf32, #tpu.memory_space<vmem>>, vector<1x256xf32>,
    return
  }
  func.func @transform_0(%arg0: i32) -> (i32, i32) {
    %c0_i32 = arith.constant 0 : i32
    %c0_i32_0 = arith.constant 0 : i32
    return %arg0, %c0_i32 : i32, i32
  }
  func.func @transform_1(%arg0: i32) -> (i32, i32) {
    %c0_i32 = arith.constant 0 : i32
    %c0_i32_0 = arith.constant 0 : i32
    %c0_i32_1 = arith.constant 0 : i32
    return %c0_i32, %c0_i32_0 : i32, i32
  }
  func.func @transform_2(%arg0: i32) -> (i32, i32) {
    %c0_i32 = arith.constant 0 : i32
    %c0_i32_0 = arith.constant 0 : i32
    %c0_i32_1 = arith.constant 0 : i32
    return %c0_i32, %c0_i32_0 : i32, i32
  }
  func.func @transform_3(%arg0: i32) -> (i32, i32, i32) {
    %c0_i32 = arith.constant 0 : i32
    %c0_i32_0 = arith.constant 0 : i32
    %c0_i32_1 = arith.constant 0 : i32
    %c0_i32_2 = arith.constant 0 : i32
    return %c0_i32, %c0_i32_0, %c0_i32_1 : i32, i32, i32
  }
  func.func @transform_4(%arg0: i32) -> (i32, i32, i32) {
    %c0_i32 = arith.constant 0 : i32
    %c0_i32_0 = arith.constant 0 : i32
    %c0_i32_1 = arith.constant 0 : i32
    %c0_i32_2 = arith.constant 0 : i32
    return %c0_i32, %c0_i32_0, %c0_i32_1 : i32, i32, i32
  }
  func.func @transform_5(%arg0: i32) -> (i32, i32, i32) {
    %c0_i32 = arith.constant 0 : i32
    %c0_i32_0 = arith.constant 0 : i32
    %c0_i32_1 = arith.constant 0 : i32
    %c0_i32_2 = arith.constant 0 : i32
    return %c0_i32, %c0_i32_0, %c0_i32_1 : i32, i32, i32
  }
  func.func @transform_6(%arg0: i32) -> (i32, i32, i32) {
    %c0_i32 = arith.constant 0 : i32
    %c0_i32_0 = arith.constant 0 : i32
    %c0_i32_1 = arith.constant 0 : i32
    %c0_i32_2 = arith.constant 0 : i32
    return %c0_i32, %c0_i32_0, %c0_i32_1 : i32, i32, i32
  }
  func.func @transform_7(%arg0: i32) -> (i32, i32) {
    %c0_i32 = arith.constant 0 : i32
    %c0_i32_0 = arith.constant 0 : i32
    %c0_i32_1 = arith.constant 0 : i32
    return %c0_i32, %c0_i32_0 : i32, i32
  }
  func.func @transform_8(%arg0: i32) -> (i32, i32) {
    %c0_i32 = arith.constant 0 : i32
    %c0_i32_0 = arith.constant 0 : i32
    %c0_i32_1 = arith.constant 0 : i32
    return %c0_i32, %c0_i32_0 : i32, i32
  }
  func.func @transform_9(%arg0: i32) -> (i32, i32) {
    %c0_i32 = arith.constant 0 : i32
    %c0_i32_0 = arith.constant 0 : i32
    return %c0_i32, %arg0 : i32, i32
  }
}

</mosaic_0001>

<bundles_post_ra>
// kernel: tpu_custom_call.1
= control target key start
LH: loop header
LB: loop body
LE: loop exit
PB: predicated region body
PF: predicated region fallthrough
CT: control target
= control target key end

     0   :  { %s2179_s0 = inlined_call_operand.vmem [shape: f32[512,16], index: 0, kind: input, shape index: {}]   ;;  %s2180_s1 = inlined_call_operand.vmem [shape: f32[32,16], index: 1, kind: input, shape index: {}]   ;;  %s2181_s2 = inlined_call_operand.vmem [shape: f32[32,1], index: 2, kind: input, shape index: {}]   ;;  %s2182_s3 = inlined_call_operand.vmem [shape: f32[2,32,32], index: 3, kind: input, shape index: {}]   ;;  %s2183_s4 = inlined_call_operand.vmem [shape: f32[2,32,1], index: 4, kind: input, shape index: {}]   ;;  %s2184_s5 = inlined_call_operand.vmem [shape: f32[2,32,32], index: 5, kind: input, shape index: {}]   ;;  %s2185_s6 = inlined_call_operand.vmem [shape: f32[2,32,1], index: 6, kind: input, shape index: {}]   ;;  %s2186_s7 = inlined_call_operand.vmem [shape: f32[32,1], index: 7, kind: input, shape index: {}]   ;;  %s2187_s8 = inlined_call_operand.<no memory space> [shape: f32[1,1], index: 8, kind: input, shape index: {}]   ;;  %s2188_s9 = inlined_call_operand.hbm [shape: f32[1,512], index: 9, kind: output, shape index: {}]  }
   0x1   :  { %v14_v0 = vstv %s2187_s8 }
   0x2   :  { %15 = vst [vmem:[#allocation2] sm:$0x1] %v14_v0 }
   0x3   :  { %16 = vsyncpa [#allocation4], 0 }
   0x4   :  { %18 = vsyncpa [#allocation4 + $0x1], 0  ;;  %s1768_s11 = smov 0   ;;  %s1770_s12 = smov 0  }
   0x5   :  { %s1772_s13 = smov 0   ;;  %s1774_s14 = smov 0  }
   0x6 LB: > { %s1369_s8 = sadd.s32 4294967295, %s1709_s14   ;;  %s1370_s15 = sadd.s32 4294967294, %s1709_s14   ;;  %s1709_s14 = sphi %s1774_s14, %s2196_s14   ;;  %s1705_s13 = sphi %s1772_s13, %s2195_s13   ;;  %s1701_s12 = sphi %s1770_s12, %s2194_s12   ;;  %s1697_s11 = sphi %s1768_s11, %s2193_s11  }
   0x7   : > { %s1791_s16 = sadd.s32 1, %s1709_s14   ;;  %s225_s17 = sadd.s32 1, %s1705_s13 }
   0x8   : > { %s222_s18 = ssub.s32 %s1709_s14, %s1791_s16  ;;  %p235_p0 = scmp.ne.s32.totalorder %s1705_s13, %s1701_s12 }
   0x9   : > { %p223_p1 = scmp.eq.s32.totalorder %s222_s18, 0  ;;  %p236_p2 = scmp.eq.s32.totalorder %s1369_s8, 1 }
   0xa   : > { %p241_p3 = scmp.ne.s32.totalorder %s1701_s12, %s1697_s11  ;;  %p242_p4 = scmp.eq.s32.totalorder %s1370_s15, 1 }
   0xb   : > { %s1801_s19 = scalar_select %p223_p1, %s1705_s13, %s225_s17  }
   0xc   : > { %p1803_p5 = por %p236_p2, %p235_p0  ;;  %p1807_p6 = por %p242_p4, %p241_p3 }
   0xd   : > { %p1373_p7 = scmp.ge.s32.totalorder %s1709_s14, 1  ;;  %p293_p8 = scmp.lt.s32.totalorder %s1709_s14, 3 }
   0xf   : > { %p294_p9 = pnand %p1373_p7, %p293_p8 }
  0x10   : > { %s1813_s22 = sshll.u32 (!%p294_p9), %s1369_s8, 5  ;;  %vm396_vm0 = vcmask (!%p294_p9), 130048   ;;  %v1818_v1 = vld [vmem:[%s2180_s1] sm:$0xff] (!%p294_p9)  ;;  %v1711_v2 = vmov (!%p294_p9), 0   ;;  %v374_v4 = vld [vmem:[%s2181_s2 + $0x10] sm:$0xff] (!%p294_p9)  ;;  %v373_v5 = vld [vmem:[%s2181_s2 + $0x8] sm:$0xff] (!%p294_p9) }
  0x11   : > { %297 = sbr.rel (%p294_p9) target bundleno = 1330 (0x532), region = 56  ;;  %p330_p10 = scmp.lt.s32.totalorder (!%p294_p9), %s1813_s22, 63  ;;  %1483 = vmatprep.mubr.msk.f32.mxu0 (!%p294_p9), %vm396_vm0, %v1818_v1  ;;  %1613 = vset.pattern.permute.xlu0 (!%p294_p9), %v1711_v2  ;;  %v372_v3 = vld [vmem:[%s2181_s2] sm:$0xff] (!%p294_p9)  ;;  %v375_v6 = vld [vmem:[%s2181_s2 + $0x18] sm:$0xff] (!%p294_p9)  ;;  %vm1843_vm1 = vmpackc.low (!%p294_p9), %vm396_vm0, %vm396_vm0  ;;  %vm622_vm2 = vcmask (!%p294_p9), 261120  }
  0x12   : > { %378 = vperm.xlu0 (!%p294_p9), %1613, %v372_v3   ;;  %1614 = vset.pattern.permute.xlu1 (!%p294_p9), %v1711_v2  ;;  %v598_v8 = vld [vmem:[%s2183_s4] sm:$0xff] (!%p294_p9)  ;;  %v599_v9 = vld [vmem:[%s2183_s4 + $0x8] sm:$0xff] (!%p294_p9)  ;;  %v600_v19 = vld [vmem:[%s2183_s4 + $0x10] sm:$0xff] (!%p294_p9)  ;;  %s326_s28 = sand.u32 (!%p294_p9), 1, %s1701_s12   ;;  %s2137_s15 = scalar_lea.hbm (!%p294_p9), %s2188_s9, %s1813_s22 }
  0x13   : > { %388 = vperm.xlu1 (!%p294_p9), %1614, %v374_v4   ;;  %v601_v22 = vld [vmem:[%s2183_s4 + $0x18] sm:$0xff] (!%p294_p9)  ;;  %v768_v26 = vld [vmem:[%s2185_s6] sm:$0xff] (!%p294_p9)  ;;  %v769_v28 = vld [vmem:[%s2185_s6 + $0x8] sm:$0xff] (!%p294_p9)  ;;  %s1714_s23 = smov (!%p294_p9), [#allocation3]  }
  0x14   : > { %v770_v29 = vld [vmem:[%s2185_s6 + $0x10] sm:$0xff] (!%p294_p9)  ;;  %v771_v32 = vld [vmem:[%s2185_s6 + $0x18] sm:$0xff] (!%p294_p9)  ;;  %v1425_v36 = vld [vmem:[%s2183_s4 + $0x20] sm:$0xff] (!%p294_p9)  ;;  %s1651_s25 = sshll.u32 (!%p294_p9), %s1714_s23, 4  ;;  %s1652_s25 = int_to_ptr.vmem [resolvable:$false] %s1651_s25 }
  0x15   : > { %v1426_v38 = vld [vmem:[%s2183_s4 + $0x28] sm:$0xff] (!%p294_p9)  ;;  %v1427_v39 = vld [vmem:[%s2183_s4 + $0x30] sm:$0xff] (!%p294_p9)  ;;  %v1428_v42 = vld [vmem:[%s2183_s4 + $0x38] sm:$0xff] (!%p294_p9)  ;;  %s1653_s26 = scalar_lea.vmem (!%p294_p9), %s1652_s25, 64 }
  0x16   : > { %383 = vperm.xlu0 (!%p294_p9), %1613, %v373_v5   ;;  %v1437_v46 = vld [vmem:[%s2185_s6 + $0x20] sm:$0xff] (!%p294_p9)  ;;  %v1438_v48 = vld [vmem:[%s2185_s6 + $0x28] sm:$0xff] (!%p294_p9)  ;;  %v1439_v49 = vld [vmem:[%s2185_s6 + $0x30] sm:$0xff] (!%p294_p9) }
  0x17   : > { %393 = vperm.xlu1 (!%p294_p9), %1614, %v375_v6   ;;  %v1440_v52 = vld [vmem:[%s2185_s6 + $0x38] sm:$0xff] (!%p294_p9)  ;;  %v1211_v56 = vld [vmem:[%s2186_s7] sm:$0xff] (!%p294_p9)  ;;  %v1212_v58 = vld [vmem:[%s2186_s7 + $0x8] sm:$0xff] (!%p294_p9) }
  0x18   : > { %s331_s29 = scalar_select %p330_p10, %s1813_s22, 63  ;;  %v1213_v59 = vld [vmem:[%s2186_s7 + $0x10] sm:$0xff]  ;;  %v1214_v62 = vld [vmem:[%s2186_s7 + $0x18] sm:$0xff]  ;;  %v1261_v3 = vld [vmem:[#allocation2] sm:$0x1] }
  0x19   : > { %v339_v7 = vld [vmem:[%s2180_s1 + $0x18] sm:$0xff] }
  0x1a   : > { %s1376_s17 = sshll.u32 %s331_s29, 3  ;;  %604 = vperm.xlu0 %1613, %v598_v8   ;;  %s1374_s29 = sshll.u32 %s326_s28, 1 }
  0x1b   : > { %s1839_s24 = scalar_lea.vmem %s2179_s0, %s1376_s17  ;;  %609 = vperm.xlu1 %1614, %v599_v9   ;;  %s328_s30 = scalar_lea.vmem [#allocation3], %s1374_s29 }
  0x1c   : > { %v356_v10 = vld [vmem:[%s1839_s24 + $0x80] sm:$0xff]  ;;  %v357_v11 = vld [vmem:[%s1839_s24 + $0x88] sm:$0xff]  ;;  %v358_v15 = vld [vmem:[%s1839_s24 + $0x90] sm:$0xff]  ;;  %s1311_s10 = sshll.u32 %s328_s30, 4  ;;  %s1297_s17 = scalar_lea.sflag [#allocation4], %s326_s28  ;;  %s2139_s10 = int_to_ptr.vmem [resolvable:$true] %s1311_s10 }
  0x1d   : > { %v340_v12 = vld [vmem:[%s1839_s24] sm:$0xff]  ;;  %v1491_v13 = vpack.c.bf16 %v357_v11, %v356_v10  ;;  %v341_v14 = vld [vmem:[%s1839_s24 + $0x8] sm:$0xff]  ;;  %v359_v16 = vld [vmem:[%s1839_s24 + $0x98] sm:$0xff]  ;;  %s1647_s18 = scalar_lea.vmem %s2139_s10, 32  ;;  %p1654_p0 = scmp.lt.s32.totalorder %s2139_s10, %s1652_s25 }
  0x1e   : > { %v1494_v17 = vpack.c.bf16 %v341_v14, %v340_v12  ;;  %v1497_v18 = vpack.c.bf16 %v359_v16, %v358_v15  ;;  %v342_v20 = vld [vmem:[%s1839_s24 + $0x10] sm:$0xff]  ;;  %v343_v21 = vld [vmem:[%s1839_s24 + $0x18] sm:$0xff]  ;;  %v360_v23 = vld [vmem:[%s1839_s24 + $0xa0] sm:$0xff]  ;;  %614 = vperm.xlu0 %1613, %v600_v19   ;;  %p1648_p11 = scmp.ne.s32.totalorder %s2139_s10, %s1647_s18  ;;  %p1655_p1 = scmp.lt.s32.totalorder %s1653_s26, %s1647_s18 }
  0x1f   : > { %1493 = vmatprep.subr.msk.bf16.mxu0 %vm1843_vm1, %v1491_v13  ;;  %v361_v24 = vld [vmem:[%s1839_s24 + $0xa8] sm:$0xff]  ;;  %v1500_v25 = vpack.c.bf16 %v343_v21, %v342_v20  ;;  %619 = vperm.xlu1 %1614, %v601_v22   ;;  %v344_v30 = vld [vmem:[%s1839_s24 + $0x20] sm:$0xff]  ;;  %v362_v33 = vld [vmem:[%s1839_s24 + $0xb0] sm:$0xff] }
  0x20   : > { %1496 = vmatpush3.bf16.xpose.msk.msra.mxu0 %vm1843_vm1, %v1494_v17  ;;  %v1503_v27 = vpack.c.bf16 %v361_v24, %v360_v23  ;;  %v345_v31 = vld [vmem:[%s1839_s24 + $0x28] sm:$0xff]  ;;  %v363_v34 = vld [vmem:[%s1839_s24 + $0xb8] sm:$0xff]  ;;  %v346_v40 = vld [vmem:[%s1839_s24 + $0x30] sm:$0xff]  ;;  %p1649_p12 = pnand %p1648_p11, %p1803_p5  ;;  %p1656_p2 = por %p1655_p1, %p1654_p0 }
  0x21   : > { %1499 = vmatprep.subr.msk.bf16.mxu0 %vm1843_vm1, %v1497_v18  ;;  %v1506_v35 = vpack.c.bf16 %v345_v31, %v344_v30  ;;  %v1509_v37 = vpack.c.bf16 %v363_v34, %v362_v33  ;;  %v347_v41 = vld [vmem:[%s1839_s24 + $0x38] sm:$0xff]  ;;  %v364_v43 = vld [vmem:[%s1839_s24 + $0xc0] sm:$0xff]  ;;  %v365_v44 = vld [vmem:[%s1839_s24 + $0xc8] sm:$0xff] }
  0x22   : > { %774 = vperm.xlu0 %1613, %v768_v26   ;;  %v1512_v45 = vpack.c.bf16 %v347_v41, %v346_v40  ;;  %v1515_v47 = vpack.c.bf16 %v365_v44, %v364_v43  ;;  %v348_v50 = vld [vmem:[%s1839_s24 + $0x40] sm:$0xff]  ;;  %v349_v51 = vld [vmem:[%s1839_s24 + $0x48] sm:$0xff]  ;;  %v366_v53 = vld [vmem:[%s1839_s24 + $0xd0] sm:$0xff]  ;;  %p1650_p13 = pneg %p1649_p12 }
  0x23   : > { %779 = vperm.xlu1 %1614, %v769_v28   ;;  %v367_v54 = vld [vmem:[%s1839_s24 + $0xd8] sm:$0xff]  ;;  %v1518_v55 = vpack.c.bf16 %v349_v51, %v348_v50  ;;  %v350_v60 = vld [vmem:[%s1839_s24 + $0x50] sm:$0xff]  ;;  %v368_v63 = vld [vmem:[%s1839_s24 + $0xe0] sm:$0xff] }
  0x24   : > { %v1521_v57 = vpack.c.bf16 %v367_v54, %v366_v53  ;;  %v351_v61 = vld [vmem:[%s1839_s24 + $0x58] sm:$0xff]  ;;  %v369_v0 = vld [vmem:[%s1839_s24 + $0xe8] sm:$0xff]  ;;  %v352_v5 = vld [vmem:[%s1839_s24 + $0x60] sm:$0xff]  ;;  %p1657_p3 = pnand %p1656_p2, %p1650_p13 }
  0x25   : > { %v1524_v2 = vpack.c.bf16 %v351_v61, %v350_v60  ;;  %v1527_v4 = vpack.c.bf16 %v369_v0, %v368_v63  ;;  %v353_v6 = vld [vmem:[%s1839_s24 + $0x68] sm:$0xff]  ;;  %v370_v8 = vld [vmem:[%s1839_s24 + $0xf0] sm:$0xff]  ;;  %v371_v9 = vld [vmem:[%s1839_s24 + $0xf8] sm:$0xff] }
  0x26   : > { %784 = vperm.xlu0 %1613, %v770_v29   ;;  %v1530_v10 = vpack.c.bf16 %v353_v6, %v352_v5  ;;  %v1533_v11 = vpack.c.bf16 %v371_v9, %v370_v8  ;;  %v354_v12 = vld [vmem:[%s1839_s24 + $0x70] sm:$0xff]  ;;  %v355_v13 = vld [vmem:[%s1839_s24 + $0x78] sm:$0xff]  ;;  %v337_v15 = vld [vmem:[%s2180_s1 + $0x8] sm:$0xff] }
  0x27   : > { %789 = vperm.xlu1 %1614, %v771_v32   ;;  %v1536_v14 = vpack.c.bf16 %v355_v13, %v354_v12  ;;  %v338_v16 = vld [vmem:[%s2180_s1 + $0x10] sm:$0xff]  ;;  %v594_v41 = vld [vmem:[%s2182_s3] sm:$0xff]  ;;  %v597_v44 = vld [vmem:[%s2182_s3 + $0x18] sm:$0xff] }
  0x28   : > { %1502 = vmatpush3.bf16.xpose.msk.msra.mxu0 %vm1843_vm1, %v1500_v25  ;;  %v596_v43 = vld [vmem:[%s2182_s3 + $0x10] sm:$0xff] }
  0x29   : > { %1505 = vmatprep.subr.msk.bf16.mxu0 %vm1843_vm1, %v1503_v27 }
  0x2a   : > { %913 = vperm.xlu0 %1613, %v1425_v36  }
  0x2b   : > { %918 = vperm.xlu1 %1614, %v1426_v38  }
  0x2e   : > { %923 = vperm.xlu0 %1613, %v1427_v39  }
  0x2f   : > { %928 = vperm.xlu1 %1614, %v1428_v42   ;;  %v595_v42 = vld [vmem:[%s2182_s3 + $0x8] sm:$0xff] }
  0x30   : > { %1508 = vmatpush3.bf16.xpose.msk.msra.mxu0 %vm1843_vm1, %v1506_v35 }
  0x31   : > { %1511 = vmatprep.subr.msk.bf16.mxu0 %vm1843_vm1, %v1509_v37 }
  0x32   : > { %1084 = vperm.xlu0 %1613, %v1437_v46  }
  0x33   : > { %1089 = vperm.xlu1 %1614, %v1438_v48  }
  0x36   : > { %1094 = vperm.xlu0 %1613, %v1439_v49  }
  0x37   : > { %1099 = vperm.xlu1 %1614, %v1440_v52  }
  0x38   : > { %1514 = vmatpush3.bf16.xpose.msk.msra.mxu0 %vm1843_vm1, %v1512_v45 }
  0x39   : > { %1517 = vmatprep.subr.msk.bf16.mxu0 %vm1843_vm1, %v1515_v47 }
  0x3a   : > { %1217 = vperm.xlu0 %1613, %v1211_v56  }
  0x3b   : > { %1222 = vperm.xlu1 %1614, %v1212_v58  }
  0x3e   : > { %1227 = vperm.xlu0 %1613, %v1213_v59  }
  0x3f   : > { %1232 = vperm.xlu1 %1614, %v1214_v62  }
  0x40   : > { %1520 = vmatpush3.bf16.xpose.msk.msra.mxu0 %vm1843_vm1, %v1518_v55 }
  0x41   : > { %1523 = vmatprep.subr.msk.bf16.mxu0 %vm1843_vm1, %v1521_v57 }
  0x42   : > { %1264 = vperm.xlu0 %1613, %v1261_v3  }
  0x48   : > { %1526 = vmatpush3.bf16.xpose.msk.msra.mxu0 %vm1843_vm1, %v1524_v2 }
  0x49   : > { %1529 = vmatprep.subr.msk.bf16.mxu0 %vm1843_vm1, %v1527_v4 }
  0x50   : > { %1532 = vmatpush3.bf16.xpose.msk.msra.mxu0 %vm1843_vm1, %v1530_v10 }
  0x51   : > { %1535 = vmatprep.subr.msk.bf16.mxu0 %vm1843_vm1, %v1533_v11 }
  0x58   : > { %1538 = vmatpush3.bf16.xpose.msk.msra.mxu0 %vm1843_vm1, %v1536_v14 }
  0x5f   : > { %1484 = vmatmul.mubr.msk.f32.vlgmr.msra.gmra.mrb[0].mxu0 %vm396_vm0, %v1818_v1  ;;  %v1712_v1 = vmov 0.0  }
  0x60   : > { %1485 = vmatprep.mubr.msk.f32.mxu0 %vm396_vm0, %v337_v15  ;;  %699 = vmatprep.mubr.f32.mxu1 %v1712_v1 }
  0x63   : > { %1486 = vmatmul.mubr.msk.f32.gmra.mrb[2].mxu0 %vm396_vm0, %v337_v15 }
  0x64   : > { %1487 = vmatprep.mubr.msk.f32.mxu0 %vm396_vm0, %v338_v16 }
  0x67   : > { %1488 = vmatmul.mubr.msk.f32.gmra.mrb[4].mxu0 %vm396_vm0, %v338_v16 }
  0x68   : > { %1489 = vmatprep.mubr.msk.f32.mxu0 %vm396_vm0, %v339_v7 }
  0x6b   : > { %1490 = vmatmul.mubr.msk.f32.gmra.mrb[6].mxu0 %vm396_vm0, %v339_v7 }
  0x91   : > { %v379_v17 = vpop.permute.xlu0 %378 }
  0x92   : > { %v389_v24 = vpop.permute.xlu1 %388 }
  0x95   : > { %v384_v20 = vpop.permute.xlu0 %383 }
  0x96   : > { %v394_v32 = vpop.permute.xlu1 %393 }
  0x99   : > { %v605_v45 = vpop.permute.xlu0 %604 }
  0x9a   : > { %v610_v51 = vpop.permute.xlu1 %609 }
  0x9d   : > { %v615_v58 = vpop.permute.xlu0 %614 }
  0x9e   : > { %v620_v2 = vpop.permute.xlu1 %619 }
 0x132   : > { %v571_v18 = vpop.f32.mrb[0].mxu0 }
 0x133   : > { %v573_v19 = vpop.f32.mrb[1].mxu0  ;;  %v1995_v27 = vadd.f32 %v571_v18, %v379_v17 }
 0x134   : > { %v1991_v25 = vadd.f32 %v573_v19, %v379_v17 }
 0x136   : > { %v577_v21 = vpop.f32.mrb[2].mxu0 }
 0x137   : > { %v1989_v22 = vadd.f32 %v577_v21, %v384_v20  ;;  %v579_v23 = vpop.f32.mrb[3].mxu0 }
 0x138   : > { %v1993_v26 = vadd.f32 %v579_v23, %v384_v20 }
 0x139   : > { %v1541_v31 = vpack.c.bf16 %v1989_v22, %v1995_v27 }
 0x13a   : > { %v583_v28 = vpop.f32.mrb[4].mxu0  ;;  %v1539_v29 = vpack.c.bf16 %v1993_v26, %v1991_v25 }
 0x13b   : > { %v585_v30 = vpop.f32.mrb[5].mxu0  ;;  %v2007_v38 = vadd.f32 %v583_v28, %v389_v24 }
 0x13c   : > { %1540 = vmatprep.subr.bf16.mxu1 %v1539_v29  ;;  %v2003_v36 = vadd.f32 %v585_v30, %v389_v24 }
 0x13d   : > { %1542 = vmatpush1.bf16.msra.mxu1 %v1541_v31 }
 0x13e   : > { %v589_v33 = vpop.f32.mrb[6].mxu0 }
 0x13f   : > { %v2001_v34 = vadd.f32 %v589_v33, %v394_v32  ;;  %v591_v35 = vpop.f32.mrb[7].mxu0 }
 0x140   : > { %v2005_v37 = vadd.f32 %v591_v35, %v394_v32 }
 0x141   : > { %v1545_v40 = vpack.c.bf16 %v2001_v34, %v2007_v38 }
 0x142   : > { %v1543_v39 = vpack.c.bf16 %v2005_v37, %v2003_v36 }
 0x144   : > { %1544 = vmatprep.subr.bf16.mxu1 %v1543_v39 }
 0x145   : > { %1546 = vmatpush1.bf16.msra.mxu1 %v1545_v40 }
 0x148   : > { %1413 = vmatmul.mubr.msk.f32.vlgmr.msra.gmra.mrb[0].mxu1 %vm622_vm2, %v594_v41 }
 0x149   : > { %705 = vmatprep.mubr.f32.mxu1 %v1712_v1 }
 0x14c   : > { %1414 = vmatmul.mubr.msk.f32.gmra.mrb[2].mxu1 %vm622_vm2, %v595_v42 }
 0x14d   : > { %711 = vmatprep.mubr.f32.mxu1 %v1712_v1 }
 0x150   : > { %1415 = vmatmul.mubr.msk.f32.gmra.mrb[4].mxu1 %vm622_vm2, %v596_v43 }
 0x151   : > { %717 = vmatprep.mubr.f32.mxu1 %v1712_v1 }
 0x154   : > { %1416 = vmatmul.mubr.msk.f32.gmra.mrb[6].mxu1 %vm622_vm2, %v597_v44 }
 0x155   : > { %868 = vmatprep.mubr.f32.mxu1 %v1712_v1 }
 0x21b   : > { %v701_v46 = vpop.f32.mrb[0].mxu1 }
 0x21c   : > { %v702_v47 = vadd.f32 %v701_v46, %v605_v45  ;;  %v703_v48 = vpop.f32.mrb[1].mxu1 }
 0x21d   : > { %v704_v49 = vadd.f32 %v703_v48, %v605_v45 }
 0x21e   : > { %v732_v50 = vmul.f32 0.70710677, %v702_v47  ;;  %v724_v7 = vmul.f32 0.5, %v702_v47 }
 0x21f   : > { %v733_v52 = vmul.f32 0.70710677, %v704_v49  ;;  %v707_v53 = vpop.f32.mrb[2].mxu1  ;;  %v725_v19 = vmul.f32 0.5, %v704_v49 }
 0x220   : > { %1615 = verf.f32 %v732_v50  ;;  %v708_v54 = vadd.f32 %v707_v53, %v610_v51  ;;  %v709_v55 = vpop.f32.mrb[3].mxu1 }
 0x221   : > { %1617 = verf.f32 %v733_v52  ;;  %v710_v56 = vadd.f32 %v709_v55, %v610_v51  ;;  %v765_v55 = vld [vmem:[%s2184_s5 + $0x8] sm:$0xff] }
 0x222   : > { %v734_v57 = vmul.f32 0.70710677, %v708_v54  ;;  %v726_v17 = vmul.f32 0.5, %v708_v54  ;;  %v764_v54 = vld [vmem:[%s2184_s5] sm:$0xff] }
 0x223   : > { %v735_v59 = vmul.f32 0.70710677, %v710_v56  ;;  %v713_v60 = vpop.f32.mrb[4].mxu1  ;;  %v727_v20 = vmul.f32 0.5, %v710_v56  ;;  %v766_v56 = vld [vmem:[%s2184_s5 + $0x10] sm:$0xff] }
 0x224   : > { %1619 = verf.f32 %v734_v57  ;;  %v714_v61 = vadd.f32 %v713_v60, %v615_v58  ;;  %v715_v62 = vpop.f32.mrb[5].mxu1  ;;  %v767_v57 = vld [vmem:[%s2184_s5 + $0x18] sm:$0xff]  ;;  %v775_v60 = vpop.permute.xlu0 %774 }
 0x225   : > { %1621 = verf.f32 %v735_v59  ;;  %v716_v63 = vadd.f32 %v715_v62, %v615_v58 }
 0x226   : > { %v736_v0 = vmul.f32 0.70710677, %v714_v61  ;;  %v728_v42 = vmul.f32 0.5, %v714_v61  ;;  %v780_v61 = vpop.permute.xlu1 %779 }
 0x227   : > { %v737_v3 = vmul.f32 0.70710677, %v716_v63  ;;  %v719_v4 = vpop.f32.mrb[6].mxu1  ;;  %v729_v45 = vmul.f32 0.5, %v716_v63 }
 0x228   : > { %1623 = verf.f32 %v736_v0  ;;  %v720_v5 = vadd.f32 %v719_v4, %v620_v2  ;;  %v721_v6 = vpop.f32.mrb[7].mxu1 }
 0x229   : > { %1625 = verf.f32 %v737_v3  ;;  %v722_v8 = vadd.f32 %v721_v6, %v620_v2 }
 0x22a   : > { %v1616_v9 = vpop.eup %1615  ;;  %v738_v10 = vmul.f32 0.70710677, %v720_v5  ;;  %v730_v43 = vmul.f32 0.5, %v720_v5 }
 0x22b   : > { %v1618_v11 = vpop.eup %1617  ;;  %v739_v12 = vmul.f32 0.70710677, %v722_v8  ;;  %v748_v13 = vadd.f32 1.0, %v1616_v9  ;;  %v731_v46 = vmul.f32 0.5, %v722_v8 }
 0x22c   : > { %1627 = verf.f32 %v738_v10  ;;  %v749_v15 = vadd.f32 1.0, %v1618_v11 }
 0x22d   : > { %1629 = verf.f32 %v739_v12  ;;  %v756_v23 = vmul.f32 %v748_v13, %v724_v7  ;;  %v785_v13 = vpop.permute.xlu0 %784 }
 0x22e   : > { %v1620_v14 = vpop.eup %1619  ;;  %v757_v29 = vmul.f32 %v749_v15, %v725_v19 }
 0x22f   : > { %v1622_v16 = vpop.eup %1621  ;;  %v750_v18 = vadd.f32 1.0, %v1620_v14 }
 0x230   : > { %v751_v21 = vadd.f32 1.0, %v1622_v16 }
 0x231   : > { %v758_v24 = vmul.f32 %v750_v18, %v726_v17 }
 0x232   : > { %v1624_v28 = vpop.eup %1623  ;;  %v759_v30 = vmul.f32 %v751_v21, %v727_v20 }
 0x233   : > { %v1626_v31 = vpop.eup %1625  ;;  %v1549_v32 = vpack.c.bf16 %v758_v24, %v756_v23  ;;  %v752_v35 = vadd.f32 1.0, %v1624_v28  ;;  %v914_v24 = vpop.permute.xlu0 %913 }
 0x234   : > { %v1547_v33 = vpack.c.bf16 %v759_v30, %v757_v29  ;;  %v753_v40 = vadd.f32 1.0, %v1626_v31 }
 0x235   : > { %v760_v48 = vmul.f32 %v752_v35, %v728_v42 }
 0x236   : > { %v1628_v39 = vpop.eup %1627  ;;  %1548 = vmatprep.subr.bf16.mxu1 %v1547_v33  ;;  %v761_v50 = vmul.f32 %v753_v40, %v729_v45 }
 0x237   : > { %v1630_v41 = vpop.eup %1629  ;;  %v754_v44 = vadd.f32 1.0, %v1628_v39  ;;  %1550 = vmatpush1.bf16.msra.mxu1 %v1549_v32 }
 0x238   : > { %v755_v47 = vadd.f32 1.0, %v1630_v41 }
 0x239   : > { %v762_v49 = vmul.f32 %v754_v44, %v730_v43  ;;  %v924_v44 = vpop.permute.xlu0 %923 }
 0x23a   : > { %v763_v51 = vmul.f32 %v755_v47, %v731_v46 }
 0x23b   : > { %v1553_v52 = vpack.c.bf16 %v762_v49, %v760_v48 }
 0x23c   : > { %v1551_v53 = vpack.c.bf16 %v763_v51, %v761_v50 }
 0x23e   : > { %1552 = vmatprep.subr.bf16.mxu1 %v1551_v53 }
 0x23f   : > { %1554 = vmatpush1.bf16.msra.mxu1 %v1553_v52 }
 0x242   : > { %1417 = vmatmul.mubr.msk.f32.vlgmr.msra.gmra.mrb[8].mxu1 %vm622_vm2, %v764_v54 }
 0x243   : > { %874 = vmatprep.mubr.f32.mxu1 %v1712_v1 }
 0x246   : > { %1418 = vmatmul.mubr.msk.f32.gmra.mrb[10].mxu1 %vm622_vm2, %v765_v55 }
 0x247   : > { %880 = vmatprep.mubr.f32.mxu1 %v1712_v1 }
 0x24a   : > { %1419 = vmatmul.mubr.msk.f32.gmra.mrb[12].mxu1 %vm622_vm2, %v766_v56 }
 0x24b   : > { %886 = vmatprep.mubr.f32.mxu1 %v1712_v1 }
 0x24e   : > { %1420 = vmatmul.mubr.msk.f32.gmra.mrb[14].mxu1 %vm622_vm2, %v767_v57 }
 0x24f   : > { %1007 = vmatprep.mubr.f32.mxu1 %v1712_v1 }
 0x315   : > { %v870_v58 = vpop.f32.mrb[8].mxu1 }
 0x316   : > { %v872_v59 = vpop.f32.mrb[9].mxu1  ;;  %v871_v0 = vadd.f32 %v870_v58, %v775_v60 }
 0x317   : > { %v873_v62 = vadd.f32 %v872_v59, %v775_v60 }
 0x318   : > { %v2063_v10 = vadd.f32 %v871_v0, %v1995_v27 }
 0x319   : > { %v876_v63 = vpop.f32.mrb[10].mxu1  ;;  %v2057_v6 = vadd.f32 %v873_v62, %v1991_v25 }
 0x31a   : > { %v877_v2 = vadd.f32 %v876_v63, %v780_v61  ;;  %v878_v3 = vpop.f32.mrb[11].mxu1 }
 0x31b   : > { %v879_v4 = vadd.f32 %v878_v3, %v780_v61 }
 0x31c   : > { %v2054_v5 = vadd.f32 %v877_v2, %v1989_v22  ;;  %v790_v22 = vpop.permute.xlu1 %789 }
 0x31d   : > { %v2060_v8 = vadd.f32 %v879_v4, %v1993_v26  ;;  %v882_v9 = vpop.f32.mrb[12].mxu1 }
 0x31e   : > { %v884_v11 = vpop.f32.mrb[13].mxu1  ;;  %v1557_v14 = vpack.c.bf16 %v2054_v5, %v2063_v10  ;;  %v883_v25 = vadd.f32 %v882_v9, %v785_v13 }
 0x31f   : > { %v1555_v12 = vpack.c.bf16 %v2060_v8, %v2057_v6  ;;  %v885_v15 = vadd.f32 %v884_v11, %v785_v13 }
 0x320   : > { %v2079_v20 = vadd.f32 %v883_v25, %v2007_v38  ;;  %v1424_v38 = vld [vmem:[%s2182_s3 + $0x38] sm:$0xff]  ;;  %v919_v33 = vpop.permute.xlu1 %918 }
 0x321   : > { %v888_v16 = vpop.f32.mrb[14].mxu1  ;;  %1556 = vmatprep.subr.bf16.mxu1 %v1555_v12  ;;  %v2073_v18 = vadd.f32 %v885_v15, %v2003_v36  ;;  %v1422_v36 = vld [vmem:[%s2182_s3 + $0x28] sm:$0xff] }
 0x322   : > { %v889_v7 = vadd.f32 %v888_v16, %v790_v22  ;;  %v890_v26 = vpop.f32.mrb[15].mxu1  ;;  %1558 = vmatpush1.bf16.msra.mxu1 %v1557_v14 }
 0x323   : > { %v891_v17 = vadd.f32 %v890_v26, %v790_v22 }
 0x324   : > { %v2070_v27 = vadd.f32 %v889_v7, %v2001_v34  ;;  %v1421_v34 = vld [vmem:[%s2182_s3 + $0x20] sm:$0xff]  ;;  %v929_v51 = vpop.permute.xlu1 %928 }
 0x325   : > { %v2076_v19 = vadd.f32 %v891_v17, %v2005_v37  ;;  %v1423_v37 = vld [vmem:[%s2182_s3 + $0x30] sm:$0xff] }
 0x326   : > { %v1561_v23 = vpack.c.bf16 %v2070_v27, %v2079_v20 }
 0x327   : > { %v1559_v21 = vpack.c.bf16 %v2076_v19, %v2073_v18 }
 0x329   : > { %1560 = vmatprep.subr.bf16.mxu1 %v1559_v21 }
 0x32a   : > { %1562 = vmatpush1.bf16.msra.mxu1 %v1561_v23 }
 0x32d   : > { %1429 = vmatmul.mubr.msk.f32.vlgmr.msra.gmra.mrb[16].mxu1 %vm622_vm2, %v1421_v34 }
 0x32e   : > { %1013 = vmatprep.mubr.f32.mxu1 %v1712_v1 }
 0x331   : > { %1430 = vmatmul.mubr.msk.f32.gmra.mrb[18].mxu1 %vm622_vm2, %v1422_v36 }
 0x332   : > { %1019 = vmatprep.mubr.f32.mxu1 %v1712_v1 }
 0x335   : > { %1431 = vmatmul.mubr.msk.f32.gmra.mrb[20].mxu1 %vm622_vm2, %v1423_v37 }
 0x336   : > { %1025 = vmatprep.mubr.f32.mxu1 %v1712_v1 }
 0x339   : > { %1432 = vmatmul.mubr.msk.f32.gmra.mrb[22].mxu1 %vm622_vm2, %v1424_v38 }
 0x33a   : > { %1178 = vmatprep.mubr.f32.mxu1 %v1712_v1 }
 0x400   : > { %v1009_v28 = vpop.f32.mrb[16].mxu1 }
 0x401   : > { %v1010_v29 = vadd.f32 %v1009_v28, %v914_v24  ;;  %v1011_v30 = vpop.f32.mrb[17].mxu1 }
 0x402   : > { %v1012_v31 = vadd.f32 %v1011_v30, %v914_v24 }
 0x403   : > { %v1040_v32 = vmul.f32 0.70710677, %v1010_v29  ;;  %v1032_v2 = vmul.f32 0.5, %v1010_v29 }
 0x404   : > { %v1041_v35 = vmul.f32 0.70710677, %v1012_v31  ;;  %v1015_v39 = vpop.f32.mrb[18].mxu1  ;;  %v1033_v9 = vmul.f32 0.5, %v1012_v31 }
 0x405   : > { %1631 = verf.f32 %v1040_v32  ;;  %v1016_v40 = vadd.f32 %v1015_v39, %v919_v33  ;;  %v1017_v41 = vpop.f32.mrb[19].mxu1 }
 0x406   : > { %1633 = verf.f32 %v1041_v35  ;;  %v1018_v42 = vadd.f32 %v1017_v41, %v919_v33  ;;  %v1434_v41 = vld [vmem:[%s2184_s5 + $0x28] sm:$0xff] }
 0x407   : > { %v1042_v43 = vmul.f32 0.70710677, %v1016_v40  ;;  %v1034_v3 = vmul.f32 0.5, %v1016_v40  ;;  %v1433_v40 = vld [vmem:[%s2184_s5 + $0x20] sm:$0xff] }
 0x408   : > { %v1043_v45 = vmul.f32 0.70710677, %v1018_v42  ;;  %v1021_v46 = vpop.f32.mrb[20].mxu1  ;;  %v1035_v11 = vmul.f32 0.5, %v1018_v42  ;;  %v1435_v42 = vld [vmem:[%s2184_s5 + $0x30] sm:$0xff] }
 0x409   : > { %1635 = verf.f32 %v1042_v43  ;;  %v1022_v47 = vadd.f32 %v1021_v46, %v924_v44  ;;  %v1023_v48 = vpop.f32.mrb[21].mxu1  ;;  %v1436_v43 = vld [vmem:[%s2184_s5 + $0x38] sm:$0xff] }
 0x40a   : > { %1637 = verf.f32 %v1043_v45  ;;  %v1024_v49 = vadd.f32 %v1023_v48, %v924_v44  ;;  %v1085_v44 = vpop.permute.xlu0 %1084  ;;  %v1090_v45 = vpop.permute.xlu1 %1089 }
 0x40b   : > { %v1044_v50 = vmul.f32 0.70710677, %v1022_v47  ;;  %v1036_v36 = vmul.f32 0.5, %v1022_v47 }
 0x40c   : > { %v1045_v52 = vmul.f32 0.70710677, %v1024_v49  ;;  %v1027_v53 = vpop.f32.mrb[22].mxu1  ;;  %v1037_v24 = vmul.f32 0.5, %v1024_v49 }
 0x40d   : > { %1639 = verf.f32 %v1044_v50  ;;  %v1028_v54 = vadd.f32 %v1027_v53, %v929_v51  ;;  %v1029_v55 = vpop.f32.mrb[23].mxu1 }
 0x40e   : > { %1641 = verf.f32 %v1045_v52  ;;  %v1030_v56 = vadd.f32 %v1029_v55, %v929_v51  ;;  %v1095_v46 = vpop.permute.xlu0 %1094  ;;  %v1100_v50 = vpop.permute.xlu1 %1099 }
 0x40f   : > { %v1632_v57 = vpop.eup %1631  ;;  %v1046_v58 = vmul.f32 0.70710677, %v1028_v54  ;;  %v1038_v37 = vmul.f32 0.5, %v1028_v54 }
 0x410   : > { %v1634_v59 = vpop.eup %1633  ;;  %v1047_v60 = vmul.f32 0.70710677, %v1030_v56  ;;  %v1056_v61 = vadd.f32 1.0, %v1632_v57  ;;  %v1039_v28 = vmul.f32 0.5, %v1030_v56 }
 0x411   : > { %1643 = verf.f32 %v1046_v58  ;;  %v1057_v63 = vadd.f32 1.0, %v1634_v59 }
 0x412   : > { %1645 = verf.f32 %v1047_v60  ;;  %v1064_v13 = vmul.f32 %v1056_v61, %v1032_v2  ;;  %v1223_v59 = vpop.permute.xlu1 %1222 }
 0x413   : > { %v1636_v62 = vpop.eup %1635  ;;  %v1065_v15 = vmul.f32 %v1057_v63, %v1033_v9 }
 0x414   : > { %v1638_v0 = vpop.eup %1637  ;;  %v1058_v4 = vadd.f32 1.0, %v1636_v62 }
 0x415   : > { %v1059_v12 = vadd.f32 1.0, %v1638_v0 }
 0x416   : > { %v1066_v14 = vmul.f32 %v1058_v4, %v1034_v3 }
 0x417   : > { %v1640_v22 = vpop.eup %1639  ;;  %v1067_v16 = vmul.f32 %v1059_v12, %v1035_v11 }
 0x418   : > { %v1642_v25 = vpop.eup %1641  ;;  %v1565_v7 = vpack.c.bf16 %v1066_v14, %v1064_v13  ;;  %v1060_v17 = vadd.f32 1.0, %v1640_v22 }
 0x419   : > { %v1563_v26 = vpack.c.bf16 %v1067_v16, %v1065_v15  ;;  %v1061_v23 = vadd.f32 1.0, %v1642_v25 }
 0x41a   : > { %v1068_v30 = vmul.f32 %v1060_v17, %v1036_v36 }
 0x41b   : > { %v1644_v21 = vpop.eup %1643  ;;  %1564 = vmatprep.subr.bf16.mxu1 %v1563_v26  ;;  %v1069_v32 = vmul.f32 %v1061_v23, %v1037_v24  ;;  %v1233_v26 = vpop.permute.xlu1 %1232 }
 0x41c   : > { %v1646_v34 = vpop.eup %1645  ;;  %v1062_v38 = vadd.f32 1.0, %v1644_v21  ;;  %1566 = vmatpush1.bf16.msra.mxu1 %v1565_v7 }
 0x41d   : > { %v1063_v29 = vadd.f32 1.0, %v1646_v34 }
 0x41e   : > { %v1070_v31 = vmul.f32 %v1062_v38, %v1038_v37 }
 0x41f   : > { %v1071_v33 = vmul.f32 %v1063_v29, %v1039_v28 }
 0x420   : > { %v1569_v35 = vpack.c.bf16 %v1070_v31, %v1068_v30  ;;  %v1713_v31 = vmov 1966171168  }
 0x421   : > { %v1567_v39 = vpack.c.bf16 %v1071_v33, %v1069_v32  ;;  %v1277_v32 = vunpack.c.l.s4 %v1713_v31 }
 0x423   : > { %1568 = vmatprep.subr.bf16.mxu1 %v1567_v39 }
 0x424   : > { %1570 = vmatpush1.bf16.msra.mxu1 %v1569_v35 }
 0x427   : > { %1441 = vmatmul.mubr.msk.f32.vlgmr.msra.gmra.mrb[24].mxu1 %vm622_vm2, %v1433_v40 }
 0x428   : > { %1184 = vmatprep.mubr.f32.mxu1 %v1712_v1 }
 0x42b   : > { %1442 = vmatmul.mubr.msk.f32.gmra.mrb[26].mxu1 %vm622_vm2, %v1434_v41  ;;  %v1278_v41 = vunpack.c.0.s8 %v1277_v32 }
 0x42c   : > { %1190 = vmatprep.mubr.f32.mxu1 %v1712_v1 }
 0x42f   : > { %1443 = vmatmul.mubr.msk.f32.gmra.mrb[28].mxu1 %vm622_vm2, %v1435_v42 }
 0x430   : > { %1196 = vmatprep.mubr.f32.mxu1 %v1712_v1  ;;  %v1218_v1 = vpop.permute.xlu0 %1217 }
 0x433   : > { %1444 = vmatmul.mubr.msk.f32.gmra.mrb[30].mxu1 %vm622_vm2, %v1436_v43 }
 0x434   : > { %v1228_v12 = vpop.permute.xlu0 %1227 }
 0x438   : > { %v1265_v39 = vpop.permute.xlu0 %1264 }
 0x4fa   : > { %v1180_v47 = vpop.f32.mrb[24].mxu1 }
 0x4fb   : > { %v1181_v48 = vadd.f32 %v1180_v47, %v1085_v44  ;;  %v1182_v49 = vpop.f32.mrb[25].mxu1 }
 0x4fc   : > { %v1183_v51 = vadd.f32 %v1182_v49, %v1085_v44 }
 0x4fd   : > { %v1203_v53 = vadd.f32 %v1181_v48, %v2063_v10 }
 0x4fe   : > { %v1186_v52 = vpop.f32.mrb[26].mxu1  ;;  %v1204_v56 = vadd.f32 %v1183_v51, %v2057_v6 }
 0x4ff   : > { %v1187_v54 = vadd.f32 %v1186_v52, %v1090_v45  ;;  %v1188_v55 = vpop.f32.mrb[27].mxu1  ;;  %v1235_v62 = vmul.f32 %v1218_v1, %v1203_v53 }
 0x500   : > { %v1189_v57 = vadd.f32 %v1188_v55, %v1090_v45  ;;  %v1236_v3 = vmul.f32 %v1218_v1, %v1204_v56 }
 0x501   : > { %v1205_v58 = vadd.f32 %v1187_v54, %v2054_v5 }
 0x502   : > { %v1206_v60 = vadd.f32 %v1189_v57, %v2060_v8  ;;  %v1192_v61 = vpop.f32.mrb[28].mxu1 }
 0x503   : > { %v1237_v63 = vmul.f32 %v1223_v59, %v1205_v58  ;;  %v1193_v0 = vadd.f32 %v1192_v61, %v1095_v46  ;;  %v1194_v2 = vpop.f32.mrb[29].mxu1 }
 0x504   : > { %v1238_v4 = vmul.f32 %v1223_v59, %v1206_v60  ;;  %v1195_v9 = vadd.f32 %v1194_v2, %v1095_v46 }
 0x505   : > { %v1243_v10 = vadd.f32 %v1237_v63, %v1235_v62  ;;  %v1207_v11 = vadd.f32 %v1193_v0, %v2079_v20  ;;  %v1267_v20 = vlaneseq }
 0x506   : > { %v1252_v13 = vadd.f32 %v1238_v4, %v1236_v3  ;;  %v1208_v6 = vadd.f32 %v1195_v9, %v2073_v18  ;;  %v1198_v14 = vpop.f32.mrb[30].mxu1 }
 0x507   : > { %v1239_v5 = vmul.f32 %v1228_v12, %v1207_v11  ;;  %v1199_v22 = vadd.f32 %v1198_v14, %v1100_v50  ;;  %v1200_v15 = vpop.f32.mrb[31].mxu1  ;;  %v1268_v24 = vshrl.u32 %v1267_v20, 7  ;;  %vm1293_vm3 = vcmp.lt.s32.totalorder %v1267_v20, 256 }
 0x508   : > { %v1240_v8 = vmul.f32 %v1228_v12, %v1208_v6  ;;  %v1201_v16 = vadd.f32 %v1200_v15, %v1100_v50 }
 0x509   : > { %v1244_v25 = vadd.f32 %v1243_v10, %v1239_v5  ;;  %v1209_v7 = vadd.f32 %v1199_v22, %v2070_v27  ;;  %v1269_v27 = vsub.s32 0, %v1268_v24  ;;  %v1281_v47 = vsub.s32 %v1278_v41, %v1268_v24 }
 0x50a   : > { %v1253_v17 = vadd.f32 %v1252_v13, %v1240_v8  ;;  %v1210_v21 = vadd.f32 %v1201_v16, %v2076_v19 }
 0x50b   : > { %v1241_v23 = vmul.f32 %v1233_v26, %v1209_v7  ;;  %v1270_v43 = vrot.slane %v1265_v39, %v1269_v27 }
 0x50c   : > { %v1242_v34 = vmul.f32 %v1233_v26, %v1210_v21 }
 0x50d   : > { %v1245_v36 = vadd.f32 %v1244_v25, %v1241_v23 }
 0x50e   : > { %v1254_v37 = vadd.f32 %v1253_v17, %v1242_v34 }
 0x50f   : > { %v1246_v18 = vrot.slane %v1245_v36, 4 }
 0x510   : > { %v1255_v38 = vrot.slane %v1254_v37, 4 }
 0x511   : > { %v1247_v28 = vadd.f32 %v1246_v18, %v1245_v36 }
 0x512   : > { %v1256_v29 = vadd.f32 %v1255_v38, %v1254_v37 }
 0x513   : > { %v1248_v30 = vrot.slane %v1247_v28, 2 }
 0x514   : > { %v1257_v33 = vrot.slane %v1256_v29, 2 }
 0x515   : > { %v1249_v35 = vadd.f32 %v1248_v30, %v1247_v28 }
 0x516   : > { %v1258_v40 = vadd.f32 %v1257_v33, %v1256_v29 }
 0x517   : > { %v1250_v19 = vrot.slane %v1249_v35, 1 }
 0x518   : > { %v1259_v42 = vrot.slane %v1258_v40, 1 }
 0x519   : > { %v1251_v44 = vadd.f32 %v1250_v19, %v1249_v35 }
 0x51a   : > { %v1260_v45 = vadd.f32 %v1259_v42, %v1258_v40 }
 0x51b   : > { %v1271_v46 = vadd.f32 %v1270_v43, %v1251_v44 }
 0x51c   : > { %v1272_v48 = vadd.f32 %v1270_v43, %v1260_v45 }
 0x51e   : > { %v1275_v49 = vcombine.low %v1271_v46, %v1272_v48 }
 0x520   : > { %v1282_v50 = vrot.slane %v1275_v49, %v1281_v47 }
 0x522   : > { %v1289_v51 = vrot.slane %v1282_v50, %v1281_v47 }
 0x524   : > { %1295 = vst.msk [vmem:[%s328_s30] sm:$0x3] %vm1293_vm3, %v1289_v51 }
 0x525   : > { %1660 = shalt.err (!%p1657_p3)
}
 0x526   : > { %s1661_s22 = scalar_lea.hbm %s2137_s15, 32  ;;  %s1665_s29 = scalar_lea.hbm %s2188_s9, 64 }
 0x527   : > { %p1662_p4 = scmp.ne.s32.totalorder %s2137_s15, %s1661_s22  ;;  %p1666_p9 = scmp.lt.u32.totalorder %s2137_s15, %s2188_s9 }
 0x528   : > { %p1667_p10 = scmp.lt.u32.totalorder %s1665_s29, %s1661_s22  ;;  %p1669_p12 = scmp.lt.u32.totalorder %s1661_s22, %s2137_s15 }
 0x529   : > { %p1663_p7 = pnand %p1662_p4, %p1803_p5 }
 0x52a   : > { %p1668_p11 = por %p1667_p10, %p1666_p9 }
 0x52b   : > { %p1664_p8 = pneg %p1663_p7 }
 0x52c   : > { %p1670_p13 = por %p1669_p12, %p1668_p11 }
 0x52e   : > { %p1671_p0 = pnand %p1670_p13, %p1664_p8 }
 0x530   : > { %1674 = shalt.err (!%p1671_p0)
}
 0x531   : > { %1571 = dma.vmem_to_hbm [thread:$0]  (%p1803_p5), %s2139_s10, 32, %s2137_s15, %s1297_s17  }
 0x532 PF: > { %p1577_p1 = scmp.ge.s32.totalorder %s1709_s14, 2  ;;  %s1323_s24 = sand.u32 1, %s1697_s11  }
 0x533   : > { %s1324_s18 = scalar_lea.sflag [#allocation4], %s1323_s24 }
 0x534   : > { %p1574_p2 = pnand %p1577_p1, %p1807_p6 }
 0x536   : > { %1692 = dma.done.wait (!%p1574_p2), %s1324_s18, 32  }
 0x537   : > { %1694 = vsyncadd (!%p1574_p2), %s1324_s18, 4294967264  ;;  %p21_p3 = scmp.ge.s32.totalorder %s1791_s16, 4   ;;  %s2193_s11 = smov %s1701_s12 }
 0x538   : > { %s2194_s12 = smov %s1705_s13  ;;  %s2195_s13 = smov %s1801_s19 }
 0x539   : > { %s2196_s14 = smov %s1791_s16  ;;  %23 = sbr.rel (!%p21_p3) target bundleno = 6 (0x6), region = 95 }
 0x540   :  { %1329 = vsyncpa [#allocation4], 1 }
 0x541   :  { %1331 = vsyncpa [#allocation4 + $0x1], 1 }

// kernel: tpu_custom_call.1
= control target key start
LH: loop header
LB: loop body
LE: loop exit
PB: predicated region body
PF: predicated region fallthrough
CT: control target
= control target key end

     0   :  { %s2179_s0 = inlined_call_operand.vmem [shape: f32[512,16], index: 0, kind: input, shape index: {}]   ;;  %s2180_s1 = inlined_call_operand.vmem [shape: f32[32,16], index: 1, kind: input, shape index: {}]   ;;  %s2181_s2 = inlined_call_operand.vmem [shape: f32[32,1], index: 2, kind: input, shape index: {}]   ;;  %s2182_s3 = inlined_call_operand.vmem [shape: f32[2,32,32], index: 3, kind: input, shape index: {}]   ;;  %s2183_s4 = inlined_call_operand.vmem [shape: f32[2,32,1], index: 4, kind: input, shape index: {}]   ;;  %s2184_s5 = inlined_call_operand.vmem [shape: f32[2,32,32], index: 5, kind: input, shape index: {}]   ;;  %s2185_s6 = inlined_call_operand.vmem [shape: f32[2,32,1], index: 6, kind: input, shape index: {}]   ;;  %s2186_s7 = inlined_call_operand.vmem [shape: f32[32,1], index: 7, kind: input, shape index: {}]   ;;  %s2187_s8 = inlined_call_operand.<no memory space> [shape: f32[1,1], index: 8, kind: input, shape index: {}]   ;;  %s2188_s9 = inlined_call_operand.hbm [shape: f32[1,512], index: 9, kind: output, shape index: {}]  }
   0x1   :  { %v14_v0 = vstv %s2187_s8 }
   0x2   :  { %15 = vst [vmem:[#allocation2] sm:$0x1] %v14_v0 }
   0x3   :  { %16 = vsyncpa [#allocation4], 0 }
   0x4   :  { %18 = vsyncpa [#allocation4 + $0x1], 0  ;;  %s1768_s11 = smov 0   ;;  %s1770_s12 = smov 0  }
   0x5   :  { %s1772_s13 = smov 0   ;;  %s1774_s14 = smov 0  }
   0x6 LB: > { %s1369_s8 = sadd.s32 4294967295, %s1709_s14   ;;  %s1370_s15 = sadd.s32 4294967294, %s1709_s14   ;;  %s1709_s14 = sphi %s1774_s14, %s2196_s14   ;;  %s1705_s13 = sphi %s1772_s13, %s2195_s13   ;;  %s1701_s12 = sphi %s1770_s12, %s2194_s12   ;;  %s1697_s11 = sphi %s1768_s11, %s2193_s11  }
   0x7   : > { %s1791_s16 = sadd.s32 1, %s1709_s14   ;;  %s225_s17 = sadd.s32 1, %s1705_s13 }
   0x8   : > { %s222_s18 = ssub.s32 %s1709_s14, %s1791_s16  ;;  %p235_p0 = scmp.ne.s32.totalorder %s1705_s13, %s1701_s12 }
   0x9   : > { %p223_p1 = scmp.eq.s32.totalorder %s222_s18, 0  ;;  %p236_p2 = scmp.eq.s32.totalorder %s1369_s8, 1 }
   0xa   : > { %p241_p3 = scmp.ne.s32.totalorder %s1701_s12, %s1697_s11  ;;  %p242_p4 = scmp.eq.s32.totalorder %s1370_s15, 1 }
   0xb   : > { %s1801_s19 = scalar_select %p223_p1, %s1705_s13, %s225_s17  }
   0xc   : > { %p1803_p5 = por %p236_p2, %p235_p0  ;;  %p1807_p6 = por %p242_p4, %p241_p3 }
   0xd   : > { %p1373_p7 = scmp.ge.s32.totalorder %s1709_s14, 1  ;;  %p293_p8 = scmp.lt.s32.totalorder %s1709_s14, 3 }
   0xf   : > { %p294_p9 = pnand %p1373_p7, %p293_p8 }
  0x10   : > { %s1813_s22 = sshll.u32 (!%p294_p9), %s1369_s8, 5  ;;  %vm396_vm0 = vcmask (!%p294_p9), 130048   ;;  %v1818_v1 = vld [vmem:[%s2180_s1] sm:$0xff] (!%p294_p9)  ;;  %v1711_v2 = vmov (!%p294_p9), 0   ;;  %v374_v4 = vld [vmem:[%s2181_s2 + $0x10] sm:$0xff] (!%p294_p9)  ;;  %v373_v5 = vld [vmem:[%s2181_s2 + $0x8] sm:$0xff] (!%p294_p9) }
  0x11   : > { %297 = sbr.rel (%p294_p9) target bundleno = 1330 (0x532), region = 56  ;;  %p330_p10 = scmp.lt.s32.totalorder (!%p294_p9), %s1813_s22, 63  ;;  %1483 = vmatprep.mubr.msk.f32.mxu0 (!%p294_p9), %vm396_vm0, %v1818_v1  ;;  %1613 = vset.pattern.permute.xlu0 (!%p294_p9), %v1711_v2  ;;  %v372_v3 = vld [vmem:[%s2181_s2] sm:$0xff] (!%p294_p9)  ;;  %v375_v6 = vld [vmem:[%s2181_s2 + $0x18] sm:$0xff] (!%p294_p9)  ;;  %vm1843_vm1 = vmpackc.low (!%p294_p9), %vm396_vm0, %vm396_vm0  ;;  %vm622_vm2 = vcmask (!%p294_p9), 261120  }
  0x12   : > { %378 = vperm.xlu0 (!%p294_p9), %1613, %v372_v3   ;;  %1614 = vset.pattern.permute.xlu1 (!%p294_p9), %v1711_v2  ;;  %v598_v8 = vld [vmem:[%s2183_s4] sm:$0xff] (!%p294_p9)  ;;  %v599_v9 = vld [vmem:[%s2183_s4 + $0x8] sm:$0xff] (!%p294_p9)  ;;  %v600_v19 = vld [vmem:[%s2183_s4 + $0x10] sm:$0xff] (!%p294_p9)  ;;  %s326_s28 = sand.u32 (!%p294_p9), 1, %s1701_s12   ;;  %s2137_s15 = scalar_lea.hbm (!%p294_p9), %s2188_s9, %s1813_s22 }
  0x13   : > { %388 = vperm.xlu1 (!%p294_p9), %1614, %v374_v4   ;;  %v601_v22 = vld [vmem:[%s2183_s4 + $0x18] sm:$0xff] (!%p294_p9)  ;;  %v768_v26 = vld [vmem:[%s2185_s6] sm:$0xff] (!%p294_p9)  ;;  %v769_v28 = vld [vmem:[%s2185_s6 + $0x8] sm:$0xff] (!%p294_p9)  ;;  %s1714_s23 = smov (!%p294_p9), [#allocation3]  }
  0x14   : > { %v770_v29 = vld [vmem:[%s2185_s6 + $0x10] sm:$0xff] (!%p294_p9)  ;;  %v771_v32 = vld [vmem:[%s2185_s6 + $0x18] sm:$0xff] (!%p294_p9)  ;;  %v1425_v36 = vld [vmem:[%s2183_s4 + $0x20] sm:$0xff] (!%p294_p9)  ;;  %s1651_s25 = sshll.u32 (!%p294_p9), %s1714_s23, 4  ;;  %s1652_s25 = int_to_ptr.vmem [resolvable:$false] %s1651_s25 }
  0x15   : > { %v1426_v38 = vld [vmem:[%s2183_s4 + $0x28] sm:$0xff] (!%p294_p9)  ;;  %v1427_v39 = vld [vmem:[%s2183_s4 + $0x30] sm:$0xff] (!%p294_p9)  ;;  %v1428_v42 = vld [vmem:[%s2183_s4 + $0x38] sm:$0xff] (!%p294_p9)  ;;  %s1653_s26 = scalar_lea.vmem (!%p294_p9), %s1652_s25, 64 }
  0x16   : > { %383 = vperm.xlu0 (!%p294_p9), %1613, %v373_v5   ;;  %v1437_v46 = vld [vmem:[%s2185_s6 + $0x20] sm:$0xff] (!%p294_p9)  ;;  %v1438_v48 = vld [vmem:[%s2185_s6 + $0x28] sm:$0xff] (!%p294_p9)  ;;  %v1439_v49 = vld [vmem:[%s2185_s6 + $0x30] sm:$0xff] (!%p294_p9) }
  0x17   : > { %393 = vperm.xlu1 (!%p294_p9), %1614, %v375_v6   ;;  %v1440_v52 = vld [vmem:[%s2185_s6 + $0x38] sm:$0xff] (!%p294_p9)  ;;  %v1211_v56 = vld [vmem:[%s2186_s7] sm:$0xff] (!%p294_p9)  ;;  %v1212_v58 = vld [vmem:[%s2186_s7 + $0x8] sm:$0xff] (!%p294_p9) }
  0x18   : > { %s331_s29 = scalar_select %p330_p10, %s1813_s22, 63  ;;  %v1213_v59 = vld [vmem:[%s2186_s7 + $0x10] sm:$0xff]  ;;  %v1214_v62 = vld [vmem:[%s2186_s7 + $0x18] sm:$0xff]  ;;  %v1261_v3 = vld [vmem:[#allocation2] sm:$0x1] }
  0x19   : > { %v339_v7 = vld [vmem:[%s2180_s1 + $0x18] sm:$0xff] }
  0x1a   : > { %s1376_s17 = sshll.u32 %s331_s29, 3  ;;  %604 = vperm.xlu0 %1613, %v598_v8   ;;  %s1374_s29 = sshll.u32 %s326_s28, 1 }
  0x1b   : > { %s1839_s24 = scalar_lea.vmem %s2179_s0, %s1376_s17  ;;  %609 = vperm.xlu1 %1614, %v599_v9   ;;  %s328_s30 = scalar_lea.vmem [#allocation3], %s1374_s29 }
  0x1c   : > { %v356_v10 = vld [vmem:[%s1839_s24 + $0x80] sm:$0xff]  ;;  %v357_v11 = vld [vmem:[%s1839_s24 + $0x88] sm:$0xff]  ;;  %v358_v15 = vld [vmem:[%s1839_s24 + $0x90] sm:$0xff]  ;;  %s1311_s10 = sshll.u32 %s328_s30, 4  ;;  %s1297_s17 = scalar_lea.sflag [#allocation4], %s326_s28  ;;  %s2139_s10 = int_to_ptr.vmem [resolvable:$true] %s1311_s10 }
  0x1d   : > { %v340_v12 = vld [vmem:[%s1839_s24] sm:$0xff]  ;;  %v1491_v13 = vpack.c.bf16 %v357_v11, %v356_v10  ;;  %v341_v14 = vld [vmem:[%s1839_s24 + $0x8] sm:$0xff]  ;;  %v359_v16 = vld [vmem:[%s1839_s24 + $0x98] sm:$0xff]  ;;  %s1647_s18 = scalar_lea.vmem %s2139_s10, 32  ;;  %p1654_p0 = scmp.lt.s32.totalorder %s2139_s10, %s1652_s25 }
  0x1e   : > { %v1494_v17 = vpack.c.bf16 %v341_v14, %v340_v12  ;;  %v1497_v18 = vpack.c.bf16 %v359_v16, %v358_v15  ;;  %v342_v20 = vld [vmem:[%s1839_s24 + $0x10] sm:$0xff]  ;;  %v343_v21 = vld [vmem:[%s1839_s24 + $0x18] sm:$0xff]  ;;  %v360_v23 = vld [vmem:[%s1839_s24 + $0xa0] sm:$0xff]  ;;  %614 = vperm.xlu0 %1613, %v600_v19   ;;  %p1648_p11 = scmp.ne.s32.totalorder %s2139_s10, %s1647_s18  ;;  %p1655_p1 = scmp.lt.s32.totalorder %s1653_s26, %s1647_s18 }
  0x1f   : > { %1493 = vmatprep.subr.msk.bf16.mxu0 %vm1843_vm1, %v1491_v13  ;;  %v361_v24 = vld [vmem:[%s1839_s24 + $0xa8] sm:$0xff]  ;;  %v1500_v25 = vpack.c.bf16 %v343_v21, %v342_v20  ;;  %619 = vperm.xlu1 %1614, %v601_v22   ;;  %v344_v30 = vld [vmem:[%s1839_s24 + $0x20] sm:$0xff]  ;;  %v362_v33 = vld [vmem:[%s1839_s24 + $0xb0] sm:$0xff] }
  0x20   : > { %1496 = vmatpush3.bf16.xpose.msk.msra.mxu0 %vm1843_vm1, %v1494_v17  ;;  %v1503_v27 = vpack.c.bf16 %v361_v24, %v360_v23  ;;  %v345_v31 = vld [vmem:[%s1839_s24 + $0x28] sm:$0xff]  ;;  %v363_v34 = vld [vmem:[%s1839_s24 + $0xb8] sm:$0xff]  ;;  %v346_v40 = vld [vmem:[%s1839_s24 + $0x30] sm:$0xff]  ;;  %p1649_p12 = pnand %p1648_p11, %p1803_p5  ;;  %p1656_p2 = por %p1655_p1, %p1654_p0 }
  0x21   : > { %1499 = vmatprep.subr.msk.bf16.mxu0 %vm1843_vm1, %v1497_v18  ;;  %v1506_v35 = vpack.c.bf16 %v345_v31, %v344_v30  ;;  %v1509_v37 = vpack.c.bf16 %v363_v34, %v362_v33  ;;  %v347_v41 = vld [vmem:[%s1839_s24 + $0x38] sm:$0xff]  ;;  %v364_v43 = vld [vmem:[%s1839_s24 + $0xc0] sm:$0xff]  ;;  %v365_v44 = vld [vmem:[%s1839_s24 + $0xc8] sm:$0xff] }
  0x22   : > { %774 = vperm.xlu0 %1613, %v768_v26   ;;  %v1512_v45 = vpack.c.bf16 %v347_v41, %v346_v40  ;;  %v1515_v47 = vpack.c.bf16 %v365_v44, %v364_v43  ;;  %v348_v50 = vld [vmem:[%s1839_s24 + $0x40] sm:$0xff]  ;;  %v349_v51 = vld [vmem:[%s1839_s24 + $0x48] sm:$0xff]  ;;  %v366_v53 = vld [vmem:[%s1839_s24 + $0xd0] sm:$0xff]  ;;  %p1650_p13 = pneg %p1649_p12 }
  0x23   : > { %779 = vperm.xlu1 %1614, %v769_v28   ;;  %v367_v54 = vld [vmem:[%s1839_s24 + $0xd8] sm:$0xff]  ;;  %v1518_v55 = vpack.c.bf16 %v349_v51, %v348_v50  ;;  %v350_v60 = vld [vmem:[%s1839_s24 + $0x50] sm:$0xff]  ;;  %v368_v63 = vld [vmem:[%s1839_s24 + $0xe0] sm:$0xff] }
  0x24   : > { %v1521_v57 = vpack.c.bf16 %v367_v54, %v366_v53  ;;  %v351_v61 = vld [vmem:[%s1839_s24 + $0x58] sm:$0xff]  ;;  %v369_v0 = vld [vmem:[%s1839_s24 + $0xe8] sm:$0xff]  ;;  %v352_v5 = vld [vmem:[%s1839_s24 + $0x60] sm:$0xff]  ;;  %p1657_p3 = pnand %p1656_p2, %p1650_p13 }
  0x25   : > { %v1524_v2 = vpack.c.bf16 %v351_v61, %v350_v60  ;;  %v1527_v4 = vpack.c.bf16 %v369_v0, %v368_v63  ;;  %v353_v6 = vld [vmem:[%s1839_s24 + $0x68] sm:$0xff]  ;;  %v370_v8 = vld [vmem:[%s1839_s24 + $0xf0] sm:$0xff]  ;;  %v371_v9 = vld [vmem:[%s1839_s24 + $0xf8] sm:$0xff] }
  0x26   : > { %784 = vperm.xlu0 %1613, %v770_v29   ;;  %v1530_v10 = vpack.c.bf16 %v353_v6, %v352_v5  ;;  %v1533_v11 = vpack.c.bf16 %v371_v9, %v370_v8  ;;  %v354_v12 = vld [vmem:[%s1839_s24 + $0x70] sm:$0xff]  ;;  %v355_v13 = vld [vmem:[%s1839_s24 + $0x78] sm:$0xff]  ;;  %v337_v15 = vld [vmem:[%s2180_s1 + $0x8] sm:$0xff] }
  0x27   : > { %789 = vperm.xlu1 %1614, %v771_v32   ;;  %v1536_v14 = vpack.c.bf16 %v355_v13, %v354_v12  ;;  %v338_v16 = vld [vmem:[%s2180_s1 + $0x10] sm:$0xff]  ;;  %v594_v41 = vld [vmem:[%s2182_s3] sm:$0xff]  ;;  %v597_v44 = vld [vmem:[%s2182_s3 + $0x18] sm:$0xff] }
  0x28   : > { %1502 = vmatpush3.bf16.xpose.msk.msra.mxu0 %vm1843_vm1, %v1500_v25  ;;  %v596_v43 = vld [vmem:[%s2182_s3 + $0x10] sm:$0xff] }
  0x29   : > { %1505 = vmatprep.subr.msk.bf16.mxu0 %vm1843_vm1, %v1503_v27 }
  0x2a   : > { %913 = vperm.xlu0 %1613, %v1425_v36  }
  0x2b   : > { %918 = vperm.xlu1 %1614, %v1426_v38  }
  0x2e   : > { %923 = vperm.xlu0 %1613, %v1427_v39  }
  0x2f   : > { %928 = vperm.xlu1 %1614, %v1428_v42   ;;  %v595_v42 = vld [vmem:[%s2182_s3 + $0x8] sm:$0xff] }
  0x30   : > { %1508 = vmatpush3.bf16.xpose.msk.msra.mxu0 %vm1843_vm1, %v1506_v35 }
  0x31   : > { %1511 = vmatprep.subr.msk.bf16.mxu0 %vm1843_vm1, %v1509_v37 }
  0x32   : > { %1084 = vperm.xlu0 %1613, %v1437_v46  }
  0x33   : > { %1089 = vperm.xlu1 %1614, %v1438_v48  }
  0x36   : > { %1094 = vperm.xlu0 %1613, %v1439_v49  }
  0x37   : > { %1099 = vperm.xlu1 %1614, %v1440_v52  }
  0x38   : > { %1514 = vmatpush3.bf16.xpose.msk.msra.mxu0 %vm1843_vm1, %v1512_v45 }
  0x39   : > { %1517 = vmatprep.subr.msk.bf16.mxu0 %vm1843_vm1, %v1515_v47 }
  0x3a   : > { %1217 = vperm.xlu0 %1613, %v1211_v56  }
  0x3b   : > { %1222 = vperm.xlu1 %1614, %v1212_v58  }
  0x3e   : > { %1227 = vperm.xlu0 %1613, %v1213_v59  }
  0x3f   : > { %1232 = vperm.xlu1 %1614, %v1214_v62  }
  0x40   : > { %1520 = vmatpush3.bf16.xpose.msk.msra.mxu0 %vm1843_vm1, %v1518_v55 }
  0x41   : > { %1523 = vmatprep.subr.msk.bf16.mxu0 %vm1843_vm1, %v1521_v57 }
  0x42   : > { %1264 = vperm.xlu0 %1613, %v1261_v3  }
  0x48   : > { %1526 = vmatpush3.bf16.xpose.msk.msra.mxu0 %vm1843_vm1, %v1524_v2 }
  0x49   : > { %1529 = vmatprep.subr.msk.bf16.mxu0 %vm1843_vm1, %v1527_v4 }
  0x50   : > { %1532 = vmatpush3.bf16.xpose.msk.msra.mxu0 %vm1843_vm1, %v1530_v10 }
  0x51   : > { %1535 = vmatprep.subr.msk.bf16.mxu0 %vm1843_vm1, %v1533_v11 }
  0x58   : > { %1538 = vmatpush3.bf16.xpose.msk.msra.mxu0 %vm1843_vm1, %v1536_v14 }
  0x5f   : > { %1484 = vmatmul.mubr.msk.f32.vlgmr.msra.gmra.mrb[0].mxu0 %vm396_vm0, %v1818_v1  ;;  %v1712_v1 = vmov 0.0  }
  0x60   : > { %1485 = vmatprep.mubr.msk.f32.mxu0 %vm396_vm0, %v337_v15  ;;  %699 = vmatprep.mubr.f32.mxu1 %v1712_v1 }
  0x63   : > { %1486 = vmatmul.mubr.msk.f32.gmra.mrb[2].mxu0 %vm396_vm0, %v337_v15 }
  0x64   : > { %1487 = vmatprep.mubr.msk.f32.mxu0 %vm396_vm0, %v338_v16 }
  0x67   : > { %1488 = vmatmul.mubr.msk.f32.gmra.mrb[4].mxu0 %vm396_vm0, %v338_v16 }
  0x68   : > { %1489 = vmatprep.mubr.msk.f32.mxu0 %vm396_vm0, %v339_v7 }
  0x6b   : > { %1490 = vmatmul.mubr.msk.f32.gmra.mrb[6].mxu0 %vm396_vm0, %v339_v7 }
  0x91   : > { %v379_v17 = vpop.permute.xlu0 %378 }
  0x92   : > { %v389_v24 = vpop.permute.xlu1 %388 }
  0x95   : > { %v384_v20 = vpop.permute.xlu0 %383 }
  0x96   : > { %v394_v32 = vpop.permute.xlu1 %393 }
  0x99   : > { %v605_v45 = vpop.permute.xlu0 %604 }
  0x9a   : > { %v610_v51 = vpop.permute.xlu1 %609 }
  0x9d   : > { %v615_v58 = vpop.permute.xlu0 %614 }
  0x9e   : > { %v620_v2 = vpop.permute.xlu1 %619 }
 0x132   : > { %v571_v18 = vpop.f32.mrb[0].mxu0 }
 0x133   : > { %v573_v19 = vpop.f32.mrb[1].mxu0  ;;  %v1995_v27 = vadd.f32 %v571_v18, %v379_v17 }
 0x134   : > { %v1991_v25 = vadd.f32 %v573_v19, %v379_v17 }
 0x136   : > { %v577_v21 = vpop.f32.mrb[2].mxu0 }
 0x137   : > { %v1989_v22 = vadd.f32 %v577_v21, %v384_v20  ;;  %v579_v23 = vpop.f32.mrb[3].mxu0 }
 0x138   : > { %v1993_v26 = vadd.f32 %v579_v23, %v384_v20 }
 0x139   : > { %v1541_v31 = vpack.c.bf16 %v1989_v22, %v1995_v27 }
 0x13a   : > { %v583_v28 = vpop.f32.mrb[4].mxu0  ;;  %v1539_v29 = vpack.c.bf16 %v1993_v26, %v1991_v25 }
 0x13b   : > { %v585_v30 = vpop.f32.mrb[5].mxu0  ;;  %v2007_v38 = vadd.f32 %v583_v28, %v389_v24 }
 0x13c   : > { %1540 = vmatprep.subr.bf16.mxu1 %v1539_v29  ;;  %v2003_v36 = vadd.f32 %v585_v30, %v389_v24 }
 0x13d   : > { %1542 = vmatpush1.bf16.msra.mxu1 %v1541_v31 }
 0x13e   : > { %v589_v33 = vpop.f32.mrb[6].mxu0 }
 0x13f   : > { %v2001_v34 = vadd.f32 %v589_v33, %v394_v32  ;;  %v591_v35 = vpop.f32.mrb[7].mxu0 }
 0x140   : > { %v2005_v37 = vadd.f32 %v591_v35, %v394_v32 }
 0x141   : > { %v1545_v40 = vpack.c.bf16 %v2001_v34, %v2007_v38 }
 0x142   : > { %v1543_v39 = vpack.c.bf16 %v2005_v37, %v2003_v36 }
 0x144   : > { %1544 = vmatprep.subr.bf16.mxu1 %v1543_v39 }
 0x145   : > { %1546 = vmatpush1.bf16.msra.mxu1 %v1545_v40 }
 0x148   : > { %1413 = vmatmul.mubr.msk.f32.vlgmr.msra.gmra.mrb[0].mxu1 %vm622_vm2, %v594_v41 }
 0x149   : > { %705 = vmatprep.mubr.f32.mxu1 %v1712_v1 }
 0x14c   : > { %1414 = vmatmul.mubr.msk.f32.gmra.mrb[2].mxu1 %vm622_vm2, %v595_v42 }
 0x14d   : > { %711 = vmatprep.mubr.f32.mxu1 %v1712_v1 }
 0x150   : > { %1415 = vmatmul.mubr.msk.f32.gmra.mrb[4].mxu1 %vm622_vm2, %v596_v43 }
 0x151   : > { %717 = vmatprep.mubr.f32.mxu1 %v1712_v1 }
 0x154   : > { %1416 = vmatmul.mubr.msk.f32.gmra.mrb[6].mxu1 %vm622_vm2, %v597_v44 }
 0x155   : > { %868 = vmatprep.mubr.f32.mxu1 %v1712_v1 }
 0x21b   : > { %v701_v46 = vpop.f32.mrb[0].mxu1 }
 0x21c   : > { %v702_v47 = vadd.f32 %v701_v46, %v605_v45  ;;  %v703_v48 = vpop.f32.mrb[1].mxu1 }
 0x21d   : > { %v704_v49 = vadd.f32 %v703_v48, %v605_v45 }
 0x21e   : > { %v732_v50 = vmul.f32 0.70710677, %v702_v47  ;;  %v724_v7 = vmul.f32 0.5, %v702_v47 }
 0x21f   : > { %v733_v52 = vmul.f32 0.70710677, %v704_v49  ;;  %v707_v53 = vpop.f32.mrb[2].mxu1  ;;  %v725_v19 = vmul.f32 0.5, %v704_v49 }
 0x220   : > { %1615 = verf.f32 %v732_v50  ;;  %v708_v54 = vadd.f32 %v707_v53, %v610_v51  ;;  %v709_v55 = vpop.f32.mrb[3].mxu1 }
 0x221   : > { %1617 = verf.f32 %v733_v52  ;;  %v710_v56 = vadd.f32 %v709_v55, %v610_v51  ;;  %v765_v55 = vld [vmem:[%s2184_s5 + $0x8] sm:$0xff] }
 0x222   : > { %v734_v57 = vmul.f32 0.70710677, %v708_v54  ;;  %v726_v17 = vmul.f32 0.5, %v708_v54  ;;  %v764_v54 = vld [vmem:[%s2184_s5] sm:$0xff] }
 0x223   : > { %v735_v59 = vmul.f32 0.70710677, %v710_v56  ;;  %v713_v60 = vpop.f32.mrb[4].mxu1  ;;  %v727_v20 = vmul.f32 0.5, %v710_v56  ;;  %v766_v56 = vld [vmem:[%s2184_s5 + $0x10] sm:$0xff] }
 0x224   : > { %1619 = verf.f32 %v734_v57  ;;  %v714_v61 = vadd.f32 %v713_v60, %v615_v58  ;;  %v715_v62 = vpop.f32.mrb[5].mxu1  ;;  %v767_v57 = vld [vmem:[%s2184_s5 + $0x18] sm:$0xff]  ;;  %v775_v60 = vpop.permute.xlu0 %774 }
 0x225   : > { %1621 = verf.f32 %v735_v59  ;;  %v716_v63 = vadd.f32 %v715_v62, %v615_v58 }
 0x226   : > { %v736_v0 = vmul.f32 0.70710677, %v714_v61  ;;  %v728_v42 = vmul.f32 0.5, %v714_v61  ;;  %v780_v61 = vpop.permute.xlu1 %779 }
 0x227   : > { %v737_v3 = vmul.f32 0.70710677, %v716_v63  ;;  %v719_v4 = vpop.f32.mrb[6].mxu1  ;;  %v729_v45 = vmul.f32 0.5, %v716_v63 }
 0x228   : > { %1623 = verf.f32 %v736_v0  ;;  %v720_v5 = vadd.f32 %v719_v4, %v620_v2  ;;  %v721_v6 = vpop.f32.mrb[7].mxu1 }
 0x229   : > { %1625 = verf.f32 %v737_v3  ;;  %v722_v8 = vadd.f32 %v721_v6, %v620_v2 }
 0x22a   : > { %v1616_v9 = vpop.eup %1615  ;;  %v738_v10 = vmul.f32 0.70710677, %v720_v5  ;;  %v730_v43 = vmul.f32 0.5, %v720_v5 }
 0x22b   : > { %v1618_v11 = vpop.eup %1617  ;;  %v739_v12 = vmul.f32 0.70710677, %v722_v8  ;;  %v748_v13 = vadd.f32 1.0, %v1616_v9  ;;  %v731_v46 = vmul.f32 0.5, %v722_v8 }
 0x22c   : > { %1627 = verf.f32 %v738_v10  ;;  %v749_v15 = vadd.f32 1.0, %v1618_v11 }
 0x22d   : > { %1629 = verf.f32 %v739_v12  ;;  %v756_v23 = vmul.f32 %v748_v13, %v724_v7  ;;  %v785_v13 = vpop.permute.xlu0 %784 }
 0x22e   : > { %v1620_v14 = vpop.eup %1619  ;;  %v757_v29 = vmul.f32 %v749_v15, %v725_v19 }
 0x22f   : > { %v1622_v16 = vpop.eup %1621  ;;  %v750_v18 = vadd.f32 1.0, %v1620_v14 }
 0x230   : > { %v751_v21 = vadd.f32 1.0, %v1622_v16 }
 0x231   : > { %v758_v24 = vmul.f32 %v750_v18, %v726_v17 }
 0x232   : > { %v1624_v28 = vpop.eup %1623  ;;  %v759_v30 = vmul.f32 %v751_v21, %v727_v20 }
 0x233   : > { %v1626_v31 = vpop.eup %1625  ;;  %v1549_v32 = vpack.c.bf16 %v758_v24, %v756_v23  ;;  %v752_v35 = vadd.f32 1.0, %v1624_v28  ;;  %v914_v24 = vpop.permute.xlu0 %913 }
 0x234   : > { %v1547_v33 = vpack.c.bf16 %v759_v30, %v757_v29  ;;  %v753_v40 = vadd.f32 1.0, %v1626_v31 }
 0x235   : > { %v760_v48 = vmul.f32 %v752_v35, %v728_v42 }
 0x236   : > { %v1628_v39 = vpop.eup %1627  ;;  %1548 = vmatprep.subr.bf16.mxu1 %v1547_v33  ;;  %v761_v50 = vmul.f32 %v753_v40, %v729_v45 }
 0x237   : > { %v1630_v41 = vpop.eup %1629  ;;  %v754_v44 = vadd.f32 1.0, %v1628_v39  ;;  %1550 = vmatpush1.bf16.msra.mxu1 %v1549_v32 }
 0x238   : > { %v755_v47 = vadd.f32 1.0, %v1630_v41 }
 0x239   : > { %v762_v49 = vmul.f32 %v754_v44, %v730_v43  ;;  %v924_v44 = vpop.permute.xlu0 %923 }
 0x23a   : > { %v763_v51 = vmul.f32 %v755_v47, %v731_v46 }
 0x23b   : > { %v1553_v52 = vpack.c.bf16 %v762_v49, %v760_v48 }
 0x23c   : > { %v1551_v53 = vpack.c.bf16 %v763_v51, %v761_v50 }
 0x23e   : > { %1552 = vmatprep.subr.bf16.mxu1 %v1551_v53 }
 0x23f   : > { %1554 = vmatpush1.bf16.msra.mxu1 %v1553_v52 }
 0x242   : > { %1417 = vmatmul.mubr.msk.f32.vlgmr.msra.gmra.mrb[8].mxu1 %vm622_vm2, %v764_v54 }
 0x243   : > { %874 = vmatprep.mubr.f32.mxu1 %v1712_v1 }
 0x246   : > { %1418 = vmatmul.mubr.msk.f32.gmra.mrb[10].mxu1 %vm622_vm2, %v765_v55 }
 0x247   : > { %880 = vmatprep.mubr.f32.mxu1 %v1712_v1 }
 0x24a   : > { %1419 = vmatmul.mubr.msk.f32.gmra.mrb[12].mxu1 %vm622_vm2, %v766_v56 }
 0x24b   : > { %886 = vmatprep.mubr.f32.mxu1 %v1712_v1 }
 0x24e   : > { %1420 = vmatmul.mubr.msk.f32.gmra.mrb[14].mxu1 %vm622_vm2, %v767_v57 }
 0x24f   : > { %1007 = vmatprep.mubr.f32.mxu1 %v1712_v1 }
 0x315   : > { %v870_v58 = vpop.f32.mrb[8].mxu1 }
 0x316   : > { %v872_v59 = vpop.f32.mrb[9].mxu1  ;;  %v871_v0 = vadd.f32 %v870_v58, %v775_v60 }
 0x317   : > { %v873_v62 = vadd.f32 %v872_v59, %v775_v60 }
 0x318   : > { %v2063_v10 = vadd.f32 %v871_v0, %v1995_v27 }
 0x319   : > { %v876_v63 = vpop.f32.mrb[10].mxu1  ;;  %v2057_v6 = vadd.f32 %v873_v62, %v1991_v25 }
 0x31a   : > { %v877_v2 = vadd.f32 %v876_v63, %v780_v61  ;;  %v878_v3 = vpop.f32.mrb[11].mxu1 }
 0x31b   : > { %v879_v4 = vadd.f32 %v878_v3, %v780_v61 }
 0x31c   : > { %v2054_v5 = vadd.f32 %v877_v2, %v1989_v22  ;;  %v790_v22 = vpop.permute.xlu1 %789 }
 0x31d   : > { %v2060_v8 = vadd.f32 %v879_v4, %v1993_v26  ;;  %v882_v9 = vpop.f32.mrb[12].mxu1 }
 0x31e   : > { %v884_v11 = vpop.f32.mrb[13].mxu1  ;;  %v1557_v14 = vpack.c.bf16 %v2054_v5, %v2063_v10  ;;  %v883_v25 = vadd.f32 %v882_v9, %v785_v13 }
 0x31f   : > { %v1555_v12 = vpack.c.bf16 %v2060_v8, %v2057_v6  ;;  %v885_v15 = vadd.f32 %v884_v11, %v785_v13 }
 0x320   : > { %v2079_v20 = vadd.f32 %v883_v25, %v2007_v38  ;;  %v1424_v38 = vld [vmem:[%s2182_s3 + $0x38] sm:$0xff]  ;;  %v919_v33 = vpop.permute.xlu1 %918 }
 0x321   : > { %v888_v16 = vpop.f32.mrb[14].mxu1  ;;  %1556 = vmatprep.subr.bf16.mxu1 %v1555_v12  ;;  %v2073_v18 = vadd.f32 %v885_v15, %v2003_v36  ;;  %v1422_v36 = vld [vmem:[%s2182_s3 + $0x28] sm:$0xff] }
 0x322   : > { %v889_v7 = vadd.f32 %v888_v16, %v790_v22  ;;  %v890_v26 = vpop.f32.mrb[15].mxu1  ;;  %1558 = vmatpush1.bf16.msra.mxu1 %v1557_v14 }
 0x323   : > { %v891_v17 = vadd.f32 %v890_v26, %v790_v22 }
 0x324   : > { %v2070_v27 = vadd.f32 %v889_v7, %v2001_v34  ;;  %v1421_v34 = vld [vmem:[%s2182_s3 + $0x20] sm:$0xff]  ;;  %v929_v51 = vpop.permute.xlu1 %928 }
 0x325   : > { %v2076_v19 = vadd.f32 %v891_v17, %v2005_v37  ;;  %v1423_v37 = vld [vmem:[%s2182_s3 + $0x30] sm:$0xff] }
 0x326   : > { %v1561_v23 = vpack.c.bf16 %v2070_v27, %v2079_v20 }
 0x327   : > { %v1559_v21 = vpack.c.bf16 %v2076_v19, %v2073_v18 }
 0x329   : > { %1560 = vmatprep.subr.bf16.mxu1 %v1559_v21 }
 0x32a   : > { %1562 = vmatpush1.bf16.msra.mxu1 %v1561_v23 }
 0x32d   : > { %1429 = vmatmul.mubr.msk.f32.vlgmr.msra.gmra.mrb[16].mxu1 %vm622_vm2, %v1421_v34 }
 0x32e   : > { %1013 = vmatprep.mubr.f32.mxu1 %v1712_v1 }
 0x331   : > { %1430 = vmatmul.mubr.msk.f32.gmra.mrb[18].mxu1 %vm622_vm2, %v1422_v36 }
 0x332   : > { %1019 = vmatprep.mubr.f32.mxu1 %v1712_v1 }
 0x335   : > { %1431 = vmatmul.mubr.msk.f32.gmra.mrb[20].mxu1 %vm622_vm2, %v1423_v37 }
 0x336   : > { %1025 = vmatprep.mubr.f32.mxu1 %v1712_v1 }
 0x339   : > { %1432 = vmatmul.mubr.msk.f32.gmra.mrb[22].mxu1 %vm622_vm2, %v1424_v38 }
 0x33a   : > { %1178 = vmatprep.mubr.f32.mxu1 %v1712_v1 }
 0x400   : > { %v1009_v28 = vpop.f32.mrb[16].mxu1 }
 0x401   : > { %v1010_v29 = vadd.f32 %v1009_v28, %v914_v24  ;;  %v1011_v30 = vpop.f32.mrb[17].mxu1 }
 0x402   : > { %v1012_v31 = vadd.f32 %v1011_v30, %v914_v24 }
 0x403   : > { %v1040_v32 = vmul.f32 0.70710677, %v1010_v29  ;;  %v1032_v2 = vmul.f32 0.5, %v1010_v29 }
 0x404   : > { %v1041_v35 = vmul.f32 0.70710677, %v1012_v31  ;;  %v1015_v39 = vpop.f32.mrb[18].mxu1  ;;  %v1033_v9 = vmul.f32 0.5, %v1012_v31 }
 0x405   : > { %1631 = verf.f32 %v1040_v32  ;;  %v1016_v40 = vadd.f32 %v1015_v39, %v919_v33  ;;  %v1017_v41 = vpop.f32.mrb[19].mxu1 }
 0x406   : > { %1633 = verf.f32 %v1041_v35  ;;  %v1018_v42 = vadd.f32 %v1017_v41, %v919_v33  ;;  %v1434_v41 = vld [vmem:[%s2184_s5 + $0x28] sm:$0xff] }
 0x407   : > { %v1042_v43 = vmul.f32 0.70710677, %v1016_v40  ;;  %v1034_v3 = vmul.f32 0.5, %v1016_v40  ;;  %v1433_v40 = vld [vmem:[%s2184_s5 + $0x20] sm:$0xff] }
 0x408   : > { %v1043_v45 = vmul.f32 0.70710677, %v1018_v42  ;;  %v1021_v46 = vpop.f32.mrb[20].mxu1  ;;  %v1035_v11 = vmul.f32 0.5, %v1018_v42  ;;  %v1435_v42 = vld [vmem:[%s2184_s5 + $0x30] sm:$0xff] }
 0x409   : > { %1635 = verf.f32 %v1042_v43  ;;  %v1022_v47 = vadd.f32 %v1021_v46, %v924_v44  ;;  %v1023_v48 = vpop.f32.mrb[21].mxu1  ;;  %v1436_v43 = vld [vmem:[%s2184_s5 + $0x38] sm:$0xff] }
 0x40a   : > { %1637 = verf.f32 %v1043_v45  ;;  %v1024_v49 = vadd.f32 %v1023_v48, %v924_v44  ;;  %v1085_v44 = vpop.permute.xlu0 %1084  ;;  %v1090_v45 = vpop.permute.xlu1 %1089 }
 0x40b   : > { %v1044_v50 = vmul.f32 0.70710677, %v1022_v47  ;;  %v1036_v36 = vmul.f32 0.5, %v1022_v47 }
 0x40c   : > { %v1045_v52 = vmul.f32 0.70710677, %v1024_v49  ;;  %v1027_v53 = vpop.f32.mrb[22].mxu1  ;;  %v1037_v24 = vmul.f32 0.5, %v1024_v49 }
 0x40d   : > { %1639 = verf.f32 %v1044_v50  ;;  %v1028_v54 = vadd.f32 %v1027_v53, %v929_v51  ;;  %v1029_v55 = vpop.f32.mrb[23].mxu1 }
 0x40e   : > { %1641 = verf.f32 %v1045_v52  ;;  %v1030_v56 = vadd.f32 %v1029_v55, %v929_v51  ;;  %v1095_v46 = vpop.permute.xlu0 %1094  ;;  %v1100_v50 = vpop.permute.xlu1 %1099 }
 0x40f   : > { %v1632_v57 = vpop.eup %1631  ;;  %v1046_v58 = vmul.f32 0.70710677, %v1028_v54  ;;  %v1038_v37 = vmul.f32 0.5, %v1028_v54 }
 0x410   : > { %v1634_v59 = vpop.eup %1633  ;;  %v1047_v60 = vmul.f32 0.70710677, %v1030_v56  ;;  %v1056_v61 = vadd.f32 1.0, %v1632_v57  ;;  %v1039_v28 = vmul.f32 0.5, %v1030_v56 }
 0x411   : > { %1643 = verf.f32 %v1046_v58  ;;  %v1057_v63 = vadd.f32 1.0, %v1634_v59 }
 0x412   : > { %1645 = verf.f32 %v1047_v60  ;;  %v1064_v13 = vmul.f32 %v1056_v61, %v1032_v2  ;;  %v1223_v59 = vpop.permute.xlu1 %1222 }
 0x413   : > { %v1636_v62 = vpop.eup %1635  ;;  %v1065_v15 = vmul.f32 %v1057_v63, %v1033_v9 }
 0x414   : > { %v1638_v0 = vpop.eup %1637  ;;  %v1058_v4 = vadd.f32 1.0, %v1636_v62 }
 0x415   : > { %v1059_v12 = vadd.f32 1.0, %v1638_v0 }
 0x416   : > { %v1066_v14 = vmul.f32 %v1058_v4, %v1034_v3 }
 0x417   : > { %v1640_v22 = vpop.eup %1639  ;;  %v1067_v16 = vmul.f32 %v1059_v12, %v1035_v11 }
 0x418   : > { %v1642_v25 = vpop.eup %1641  ;;  %v1565_v7 = vpack.c.bf16 %v1066_v14, %v1064_v13  ;;  %v1060_v17 = vadd.f32 1.0, %v1640_v22 }
 0x419   : > { %v1563_v26 = vpack.c.bf16 %v1067_v16, %v1065_v15  ;;  %v1061_v23 = vadd.f32 1.0, %v1642_v25 }
 0x41a   : > { %v1068_v30 = vmul.f32 %v1060_v17, %v1036_v36 }
 0x41b   : > { %v1644_v21 = vpop.eup %1643  ;;  %1564 = vmatprep.subr.bf16.mxu1 %v1563_v26  ;;  %v1069_v32 = vmul.f32 %v1061_v23, %v1037_v24  ;;  %v1233_v26 = vpop.permute.xlu1 %1232 }
 0x41c   : > { %v1646_v34 = vpop.eup %1645  ;;  %v1062_v38 = vadd.f32 1.0, %v1644_v21  ;;  %1566 = vmatpush1.bf16.msra.mxu1 %v1565_v7 }
 0x41d   : > { %v1063_v29 = vadd.f32 1.0, %v1646_v34 }
 0x41e   : > { %v1070_v31 = vmul.f32 %v1062_v38, %v1038_v37 }
 0x41f   : > { %v1071_v33 = vmul.f32 %v1063_v29, %v1039_v28 }
 0x420   : > { %v1569_v35 = vpack.c.bf16 %v1070_v31, %v1068_v30  ;;  %v1713_v31 = vmov 1966171168  }
 0x421   : > { %v1567_v39 = vpack.c.bf16 %v1071_v33, %v1069_v32  ;;  %v1277_v32 = vunpack.c.l.s4 %v1713_v31 }
 0x423   : > { %1568 = vmatprep.subr.bf16.mxu1 %v1567_v39 }
 0x424   : > { %1570 = vmatpush1.bf16.msra.mxu1 %v1569_v35 }
 0x427   : > { %1441 = vmatmul.mubr.msk.f32.vlgmr.msra.gmra.mrb[24].mxu1 %vm622_vm2, %v1433_v40 }
 0x428   : > { %1184 = vmatprep.mubr.f32.mxu1 %v1712_v1 }
 0x42b   : > { %1442 = vmatmul.mubr.msk.f32.gmra.mrb[26].mxu1 %vm622_vm2, %v1434_v41  ;;  %v1278_v41 = vunpack.c.0.s8 %v1277_v32 }
 0x42c   : > { %1190 = vmatprep.mubr.f32.mxu1 %v1712_v1 }
 0x42f   : > { %1443 = vmatmul.mubr.msk.f32.gmra.mrb[28].mxu1 %vm622_vm2, %v1435_v42 }
 0x430   : > { %1196 = vmatprep.mubr.f32.mxu1 %v1712_v1  ;;  %v1218_v1 = vpop.permute.xlu0 %1217 }
 0x433   : > { %1444 = vmatmul.mubr.msk.f32.gmra.mrb[30].mxu1 %vm622_vm2, %v1436_v43 }
 0x434   : > { %v1228_v12 = vpop.permute.xlu0 %1227 }
 0x438   : > { %v1265_v39 = vpop.permute.xlu0 %1264 }
 0x4fa   : > { %v1180_v47 = vpop.f32.mrb[24].mxu1 }
 0x4fb   : > { %v1181_v48 = vadd.f32 %v1180_v47, %v1085_v44  ;;  %v1182_v49 = vpop.f32.mrb[25].mxu1 }
 0x4fc   : > { %v1183_v51 = vadd.f32 %v1182_v49, %v1085_v44 }
 0x4fd   : > { %v1203_v53 = vadd.f32 %v1181_v48, %v2063_v10 }
 0x4fe   : > { %v1186_v52 = vpop.f32.mrb[26].mxu1  ;;  %v1204_v56 = vadd.f32 %v1183_v51, %v2057_v6 }
 0x4ff   : > { %v1187_v54 = vadd.f32 %v1186_v52, %v1090_v45  ;;  %v1188_v55 = vpop.f32.mrb[27].mxu1  ;;  %v1235_v62 = vmul.f32 %v1218_v1, %v1203_v53 }
 0x500   : > { %v1189_v57 = vadd.f32 %v1188_v55, %v1090_v45  ;;  %v1236_v3 = vmul.f32 %v1218_v1, %v1204_v56 }
 0x501   : > { %v1205_v58 = vadd.f32 %v1187_v54, %v2054_v5 }
 0x502   : > { %v1206_v60 = vadd.f32 %v1189_v57, %v2060_v8  ;;  %v1192_v61 = vpop.f32.mrb[28].mxu1 }
 0x503   : > { %v1237_v63 = vmul.f32 %v1223_v59, %v1205_v58  ;;  %v1193_v0 = vadd.f32 %v1192_v61, %v1095_v46  ;;  %v1194_v2 = vpop.f32.mrb[29].mxu1 }
 0x504   : > { %v1238_v4 = vmul.f32 %v1223_v59, %v1206_v60  ;;  %v1195_v9 = vadd.f32 %v1194_v2, %v1095_v46 }
 0x505   : > { %v1243_v10 = vadd.f32 %v1237_v63, %v1235_v62  ;;  %v1207_v11 = vadd.f32 %v1193_v0, %v2079_v20  ;;  %v1267_v20 = vlaneseq }
 0x506   : > { %v1252_v13 = vadd.f32 %v1238_v4, %v1236_v3  ;;  %v1208_v6 = vadd.f32 %v1195_v9, %v2073_v18  ;;  %v1198_v14 = vpop.f32.mrb[30].mxu1 }
 0x507   : > { %v1239_v5 = vmul.f32 %v1228_v12, %v1207_v11  ;;  %v1199_v22 = vadd.f32 %v1198_v14, %v1100_v50  ;;  %v1200_v15 = vpop.f32.mrb[31].mxu1  ;;  %v1268_v24 = vshrl.u32 %v1267_v20, 7  ;;  %vm1293_vm3 = vcmp.lt.s32.totalorder %v1267_v20, 256 }
 0x508   : > { %v1240_v8 = vmul.f32 %v1228_v12, %v1208_v6  ;;  %v1201_v16 = vadd.f32 %v1200_v15, %v1100_v50 }
 0x509   : > { %v1244_v25 = vadd.f32 %v1243_v10, %v1239_v5  ;;  %v1209_v7 = vadd.f32 %v1199_v22, %v2070_v27  ;;  %v1269_v27 = vsub.s32 0, %v1268_v24  ;;  %v1281_v47 = vsub.s32 %v1278_v41, %v1268_v24 }
 0x50a   : > { %v1253_v17 = vadd.f32 %v1252_v13, %v1240_v8  ;;  %v1210_v21 = vadd.f32 %v1201_v16, %v2076_v19 }
 0x50b   : > { %v1241_v23 = vmul.f32 %v1233_v26, %v1209_v7  ;;  %v1270_v43 = vrot.slane %v1265_v39, %v1269_v27 }
 0x50c   : > { %v1242_v34 = vmul.f32 %v1233_v26, %v1210_v21 }
 0x50d   : > { %v1245_v36 = vadd.f32 %v1244_v25, %v1241_v23 }
 0x50e   : > { %v1254_v37 = vadd.f32 %v1253_v17, %v1242_v34 }
 0x50f   : > { %v1246_v18 = vrot.slane %v1245_v36, 4 }
 0x510   : > { %v1255_v38 = vrot.slane %v1254_v37, 4 }
 0x511   : > { %v1247_v28 = vadd.f32 %v1246_v18, %v1245_v36 }
 0x512   : > { %v1256_v29 = vadd.f32 %v1255_v38, %v1254_v37 }
 0x513   : > { %v1248_v30 = vrot.slane %v1247_v28, 2 }
 0x514   : > { %v1257_v33 = vrot.slane %v1256_v29, 2 }
 0x515   : > { %v1249_v35 = vadd.f32 %v1248_v30, %v1247_v28 }
 0x516   : > { %v1258_v40 = vadd.f32 %v1257_v33, %v1256_v29 }
 0x517   : > { %v1250_v19 = vrot.slane %v1249_v35, 1 }
 0x518   : > { %v1259_v42 = vrot.slane %v1258_v40, 1 }
 0x519   : > { %v1251_v44 = vadd.f32 %v1250_v19, %v1249_v35 }
 0x51a   : > { %v1260_v45 = vadd.f32 %v1259_v42, %v1258_v40 }
 0x51b   : > { %v1271_v46 = vadd.f32 %v1270_v43, %v1251_v44 }
 0x51c   : > { %v1272_v48 = vadd.f32 %v1270_v43, %v1260_v45 }
 0x51e   : > { %v1275_v49 = vcombine.low %v1271_v46, %v1272_v48 }
 0x520   : > { %v1282_v50 = vrot.slane %v1275_v49, %v1281_v47 }
 0x522   : > { %v1289_v51 = vrot.slane %v1282_v50, %v1281_v47 }
 0x524   : > { %1295 = vst.msk [vmem:[%s328_s30] sm:$0x3] %vm1293_vm3, %v1289_v51 }
 0x525   : > { %1660 = shalt.err (!%p1657_p3)
}
 0x526   : > { %s1661_s22 = scalar_lea.hbm %s2137_s15, 32  ;;  %s1665_s29 = scalar_lea.hbm %s2188_s9, 64 }
 0x527   : > { %p1662_p4 = scmp.ne.s32.totalorder %s2137_s15, %s1661_s22  ;;  %p1666_p9 = scmp.lt.u32.totalorder %s2137_s15, %s2188_s9 }
 0x528   : > { %p1667_p10 = scmp.lt.u32.totalorder %s1665_s29, %s1661_s22  ;;  %p1669_p12 = scmp.lt.u32.totalorder %s1661_s22, %s2137_s15 }
 0x529   : > { %p1663_p7 = pnand %p1662_p4, %p1803_p5 }
 0x52a   : > { %p1668_p11 = por %p1667_p10, %p1666_p9 }
 0x52b   : > { %p1664_p8 = pneg %p1663_p7 }
 0x52c   : > { %p1670_p13 = por %p1669_p12, %p1668_p11 }
 0x52e   : > { %p1671_p0 = pnand %p1670_p13, %p1664_p8 }
 0x530   : > { %1674 = shalt.err (!%p1671_p0)
}
 0x531   : > { %1571 = dma.vmem_to_hbm [thread:$0]  (%p1803_p5), %s2139_s10, 32, %s2137_s15, %s1297_s17  }
 0x532 PF: > { %p1577_p1 = scmp.ge.s32.totalorder %s1709_s14, 2  ;;  %s1323_s24 = sand.u32 1, %s1697_s11  }
 0x533   : > { %s1324_s18 = scalar_lea.sflag [#allocation4], %s1323_s24 }
 0x534   : > { %p1574_p2 = pnand %p1577_p1, %p1807_p6 }
 0x536   : > { %1692 = dma.done.wait (!%p1574_p2), %s1324_s18, 32  }
 0x537   : > { %1694 = vsyncadd (!%p1574_p2), %s1324_s18, 4294967264  ;;  %p21_p3 = scmp.ge.s32.totalorder %s1791_s16, 4   ;;  %s2193_s11 = smov %s1701_s12 }
 0x538   : > { %s2194_s12 = smov %s1705_s13  ;;  %s2195_s13 = smov %s1801_s19 }
 0x539   : > { %s2196_s14 = smov %s1791_s16  ;;  %23 = sbr.rel (!%p21_p3) target bundleno = 6 (0x6), region = 95 }
 0x540   :  { %1329 = vsyncpa [#allocation4], 1 }
 0x541   :  { %1331 = vsyncpa [#allocation4 + $0x1], 1 }

</bundles_post_ra>
